<compile_context>
chip_gen: v7x
topology: tpu7x:2x2x1
jax: 0.10.0
libtpu: 0.0.40
codegen_flags: <defaults>
</compile_context>

<pallas_src>
import functools

import jax
import jax.numpy as jnp
from jax.experimental import pallas as pl
from jax.experimental.pallas import tpu as pltpu


def _distill_kernel(c_prime,
                    demand_ref, wf1_ref, bf1_ref, wgb_ref, bgb_ref,
                    s_ref, wcomb_ref, bcomb_ref,
                    bev_ref,
                    out_ref,
                    gb_ref, acc_ref):
    """Grid = (spatial tile t [parallel, outer], collaborator a [arbitrary, inner])."""
    a = pl.program_id(1)

    # FiLM head + accumulator (re)init: once per spatial tile, not per collaborator.
    @pl.when(a == 0)
    def _():
        hid = jnp.dot(demand_ref[...], wf1_ref[...],
                      preferred_element_type=jnp.float32) + bf1_ref[...]
        hid = jnp.maximum(hid, 0.0)
        gb = jnp.dot(hid, wgb_ref[...],
                     preferred_element_type=jnp.float32) + bgb_ref[...]
        gb_ref[0] = gb[:, :c_prime]          # gamma  (lane split done once per tile)
        gb_ref[1] = gb[:, c_prime:]          # beta
        acc_ref[...] = jnp.zeros_like(acc_ref)

    # Reconstruction head: the three encoders + 1x1 fusion conv folded into one matmul.
    h_prime = jnp.dot(s_ref[...], wcomb_ref[...],
                      preferred_element_type=jnp.float32) + bcomb_ref[...]

    # FiLM modulation (f32 elementwise path) + elementwise squared-error accumulation
    # (no per-step cross-lane reduction, no per-step scalar RMW).
    bev = bev_ref[...].astype(jnp.float32)
    diff = h_prime - (gb_ref[0] * bev + gb_ref[1])
    acc_ref[...] = acc_ref[...] + diff * diff

    # Per-tile partial sum written once at the last collaborator; mean finished in wrapper.
    @pl.when(a == pl.num_programs(1) - 1)
    def _():
        out_ref[...] = jnp.sum(acc_ref[...], axis=0, keepdims=True)


def _pick_tile(hw, requested):
    """Largest tile <= requested that divides HW and is sublane-aligned (or HW itself)."""
    t = min(requested, hw)
    if hw % t == 0 and (t % 8 == 0 or t == hw):
        return t
    for cand in range(t - t % 8, 0, -8):
        if hw % cand == 0:
            return cand
    return hw


def distillation_loss(ego_demand, collaborator_bevs, sparse_g1, sparse_g2, sparse_g3,
                      params, *, tile=1024, activation_dtype=jnp.float32):
    """ego_demand: [1,3,H,W]; collaborator_bevs: [A,C',H,W]; sparse_gX: [A,C_gX,H,W] (NCHW)."""
    A, c_prime, H, W = collaborator_bevs.shape
    HW = H * W
    tile = _pick_tile(HW, tile)
    nt = HW // tile
    w = params

    # --- glue: im2col for the 3x3 / pad=1 conv on ego_demand ((c_in, ky, kx)-major = wf1 rows) ---
    padded = jnp.pad(ego_demand[0], ((0, 0), (1, 1), (1, 1)))            # [3, H+2, W+2]
    patches = [padded[:, dy:dy + H, dx:dx + W] for dy in range(3) for dx in range(3)]
    cols = jnp.stack(patches, axis=1).reshape(3 * 9, HW).T.astype(jnp.float32)   # [HW, 27]

    # --- glue: NCHW -> (A, H*W, C), channels on the lane axis ---
    def flat(x):
        return jnp.transpose(x, (0, 2, 3, 1)).reshape(x.shape[0], HW, x.shape[1])

    s_cat = jnp.concatenate([flat(sparse_g1), flat(sparse_g2), flat(sparse_g3)],
                            axis=-1).astype(activation_dtype)            # [A, HW, sum C_g]
    bev = flat(collaborator_bevs).astype(activation_dtype)               # [A, HW, C']

    # --- fold encoders + 1x1 fusion conv into one weight/bias (all linear -> exact) ---
    cg1, cg2, cg3 = w['we1'].shape[0], w['we2'].shape[0], w['we3'].shape[0]
    ce1, ce2, ce3 = w['we1'].shape[1], w['we2'].shape[1], w['we3'].shape[1]
    w_blk = jnp.zeros((cg1 + cg2 + cg3, ce1 + ce2 + ce3), jnp.float32)
    w_blk = w_blk.at[:cg1, :ce1].set(w['we1'])
    w_blk = w_blk.at[cg1:cg1 + cg2, ce1:ce1 + ce2].set(w['we2'])
    w_blk = w_blk.at[cg1 + cg2:, ce1 + ce2:].set(w['we3'])
    w_comb = (w_blk @ w['wf']).astype(activation_dtype)                  # [sum C_g, C']
    b_comb = (jnp.concatenate([w['be1'], w['be2'], w['be3']], axis=-1) @ w['wf']
              + w['bf']).astype(jnp.float32)                             # [1, C']

    # --- fuse the gamma / beta 1x1 convs into one matmul ---
    wgb = jnp.concatenate([w['wg'], w['wb']], axis=-1).astype(jnp.float32)   # [32, 2C']
    bgb = jnp.concatenate([w['bg'], w['bb']], axis=-1).astype(jnp.float32)   # [1, 2C']
    wf1 = w['wf1'].astype(jnp.float32)
    bf1 = w['bf1'].astype(jnp.float32)

    def full(arr):
        nd = arr.ndim
        return pl.BlockSpec(arr.shape, lambda t, a, _nd=nd: (0,) * _nd)

    def per_agent(c):
        return pl.BlockSpec((pl.Squeezed(), tile, c), lambda t, a: (a, t, 0))

    kernel = functools.partial(_distill_kernel, c_prime)

    partials = pl.pallas_call(
        kernel,
        out_shape=jax.ShapeDtypeStruct((nt, c_prime), jnp.float32),
        grid=(nt, A),
        in_specs=[
            pl.BlockSpec((tile, 27), lambda t, a: (t, 0)),   # demand im2col cols (const over a)
            full(wf1), full(bf1), full(wgb), full(bgb),
            per_agent(s_cat.shape[-1]), full(w_comb), full(b_comb),
            per_agent(c_prime),
        ],
        out_specs=pl.BlockSpec((1, c_prime), lambda t, a: (t, 0)),
        scratch_shapes=[
            pltpu.VMEM((2, tile, c_prime), jnp.float32),     # gamma / beta, reused across agents
            pltpu.VMEM((tile, c_prime), jnp.float32),        # per-tile squared-error accumulator
        ],
        compiler_params=pltpu.CompilerParams(
            dimension_semantics=("parallel", "arbitrary"),
            vmem_limit_bytes=32 * 1024 * 1024),
    )(cols, wf1, bf1, wgb, bgb, s_cat, w_comb, b_comb, bev)

    return jnp.sum(partials) / (A * HW * c_prime)


def _reference(ego_demand, bevs, sg1, sg2, sg3, w):
    """Pure-JAX reference mirroring the PyTorch forward (3x3 conv via lax conv,
    independent of the kernel's im2col path — validates the column ordering)."""
    A, c_prime, H, W = bevs.shape
    HW = H * W

    w3 = w['wf1'].T.reshape(32, 3, 3, 3)                      # OIHW (rows of wf1 are (cin,ky,kx)-major)
    pre = jax.lax.conv_general_dilated(
        ego_demand, w3, (1, 1), 'SAME',
        dimension_numbers=('NCHW', 'OIHW', 'NCHW'))           # [1, 32, H, W]
    hid = jnp.maximum(pre + w['bf1'].reshape(1, 32, 1, 1), 0.0)
    hid = jnp.transpose(hid[0], (1, 2, 0)).reshape(HW, 32)

    gamma = hid @ w['wg'] + w['bg']                           # [HW, C']
    beta = hid @ w['wb'] + w['bb']

    def flat(x):
        return jnp.transpose(x, (0, 2, 3, 1)).reshape(x.shape[0], HW, x.shape[1])

    e1 = flat(sg1) @ w['we1'] + w['be1']
    e2 = flat(sg2) @ w['we2'] + w['be2']
    e3 = flat(sg3) @ w['we3'] + w['be3']
    h_prime = jnp.concatenate([e1, e2, e3], axis=-1) @ w['wf'] + w['bf']

    i_aware = gamma[None] * flat(bevs) + beta[None]
    return jnp.mean((h_prime - i_aware) ** 2)


if __name__ == "__main__":
    # Small shapes consistent with the module's forward.
    A = 2            # N-1 collaborators
    H = W = 16
    C_PRIME = 16     # unified_bev channels C'
    C_G1, C_G2, C_G3 = 4, 6, 8
    C_ENC = 16       # per-encoder output channels

    key = jax.random.PRNGKey(0)
    keys = jax.random.split(key, 20)

    def nrm(k, shape, scale=0.1):
        return (scale * jax.random.normal(k, shape)).astype(jnp.float32)

    params = {
        'wf1': nrm(keys[0], (27, 32)),         'bf1': nrm(keys[1], (1, 32)),
        'wg':  nrm(keys[2], (32, C_PRIME)),    'bg':  nrm(keys[3], (1, C_PRIME)),
        'wb':  nrm(keys[4], (32, C_PRIME)),    'bb':  nrm(keys[5], (1, C_PRIME)),
        'we1': nrm(keys[6], (C_G1, C_ENC)),    'be1': nrm(keys[7], (1, C_ENC)),
        'we2': nrm(keys[8], (C_G2, C_ENC)),    'be2': nrm(keys[9], (1, C_ENC)),
        'we3': nrm(keys[10], (C_G3, C_ENC)),   'be3': nrm(keys[11], (1, C_ENC)),
        'wf':  nrm(keys[12], (3 * C_ENC, C_PRIME)), 'bf': nrm(keys[13], (1, C_PRIME)),
    }

    ego_demand = jax.random.normal(keys[14], (1, 3, H, W), dtype=jnp.float32)
    bevs = jax.random.normal(keys[15], (A, C_PRIME, H, W), dtype=jnp.float32)
    sg1 = jax.random.normal(keys[16], (A, C_G1, H, W), dtype=jnp.float32)
    sg2 = jax.random.normal(keys[17], (A, C_G2, H, W), dtype=jnp.float32)
    sg3 = jax.random.normal(keys[18], (A, C_G3, H, W), dtype=jnp.float32)

    ref = jax.block_until_ready(_reference(ego_demand, bevs, sg1, sg2, sg3, params))

    # f32 activations: must match the PyTorch-equivalent reference tightly.
    loss = jax.block_until_ready(
        distillation_loss(ego_demand, bevs, sg1, sg2, sg3, params))
    assert jnp.allclose(loss, ref, rtol=1e-4, atol=1e-5), (loss, ref)

    # bf16 activation path (HBM-bandwidth optimization for v6e/v7x): loose tolerance.
    loss_bf16 = jax.block_until_ready(
        distillation_loss(ego_demand, bevs, sg1, sg2, sg3, params,
                          activation_dtype=jnp.bfloat16))
    assert jnp.allclose(loss_bf16, ref, rtol=1e-1, atol=1e-2), (loss_bf16, ref)

    print("KERNEL_OK")
</pallas_src>

<mosaic_0001>
module attributes {stable_mosaic.version = 11 : i64} {
  func.func @_distill_kernel(%arg0: i32, %arg1: i32, %arg2: memref<256x27xf32, #tpu.memory_space<vmem>>, %arg3: memref<27x32xf32, #tpu.memory_space<vmem>>, %arg4: memref<1x32xf32, #tpu.memory_space<vmem>>, %arg5: memref<32x32xf32, #tpu.memory_space<vmem>>, %arg6: memref<1x32xf32, #tpu.memory_space<vmem>>, %arg7: memref<1x256x18xf32, #tpu.memory_space<vmem>>, %arg8: memref<18x16xf32, #tpu.memory_space<vmem>>, %arg9: memref<1x16xf32, #tpu.memory_space<vmem>>, %arg10: memref<1x256x16xf32, #tpu.memory_space<vmem>>, %arg11: memref<1x16xf32, #tpu.memory_space<vmem>>, %arg12: memref<2x256x16xf32, #tpu.memory_space<vmem>>, %arg13: memref<256x16xf32, #tpu.memory_space<vmem>>) attributes {dimension_semantics = [#tpu.dimension_semantics<parallel>, #tpu.dimension_semantics<arbitrary>], iteration_bounds = array<i64: 1, 2>, scalar_prefetch = 0 : i64, scratch_operands = 2 : i64, tpu.core_type = #tpu.core_type<tc>, window_params = [{transform_indices = @transform_0, window_bounds = array<i64: 256, 27>}, {pipeline_mode = #tpu.pipeline_mode<synchronous>, transform_indices = @transform_1, window_bounds = array<i64: 27, 32>}, {pipeline_mode = #tpu.pipeline_mode<synchronous>, transform_indices = @transform_2, window_bounds = array<i64: 1, 32>}, {pipeline_mode = #tpu.pipeline_mode<synchronous>, transform_indices = @transform_3, window_bounds = array<i64: 32, 32>}, {pipeline_mode = #tpu.pipeline_mode<synchronous>, transform_indices = @transform_4, window_bounds = array<i64: 1, 32>}, {transform_indices = @transform_5, window_bounds = array<i64: 1, 256, 18>}, {pipeline_mode = #tpu.pipeline_mode<synchronous>, transform_indices = @transform_6, window_bounds = array<i64: 18, 16>}, {pipeline_mode = #tpu.pipeline_mode<synchronous>, transform_indices = @transform_7, window_bounds = array<i64: 1, 16>}, {transform_indices = @transform_8, window_bounds = array<i64: 1, 256, 16>}, {transform_indices = @transform_9, window_bounds = array<i64: 1, 16>}]} {
    %c0_i32 = arith.constant 0 : i32
    %0 = arith.cmpi eq, %arg1, %c0_i32 : i32
    %1 = arith.extui %0 : i1 to i32
    %c0_i32_0 = arith.constant 0 : i32
    %2 = arith.cmpi ne, %1, %c0_i32_0 : i32
    scf.if %2 {
      %c0_20 = arith.constant 0 : index
      %c0_21 = arith.constant 0 : index
      %26 = vector.load %arg2[%c0_20, %c0_21] : memref<256x27xf32, #tpu.memory_space<vmem>>, vector<256x27xf32>
      %c0_22 = arith.constant 0 : index
      %c0_23 = arith.constant 0 : index
      %27 = vector.load %arg3[%c0_22, %c0_23] : memref<27x32xf32, #tpu.memory_space<vmem>>, vector<27x32xf32>
      %cst_24 = arith.constant dense<0.000000e+00> : vector<256x32xf32>
      %28 = tpu.matmul %26, %27, %cst_24 {dimension_numbers = #tpu.dot_dimension_numbers<[1], [0], [0], [1], [0, 0, 1, 1], [], []>} : vector<256x27xf32>, vector<27x32xf32>, vector<256x32xf32> -> vector<256x32xf32>
      %c0_25 = arith.constant 0 : index
      %c0_26 = arith.constant 0 : index
      %29 = vector.load %arg4[%c0_25, %c0_26] : memref<1x32xf32, #tpu.memory_space<vmem>>, vector<1x32xf32>
      %30 = vector.broadcast %29 : vector<1x32xf32> to vector<256x32xf32>
      %31 = arith.addf %28, %30 : vector<256x32xf32>
      %cst_27 = arith.constant 0.000000e+00 : f32
      %32 = vector.broadcast %cst_27 : f32 to vector<256x32xf32>
      %33 = arith.maximumf %31, %32 : vector<256x32xf32>
      %c0_28 = arith.constant 0 : index
      %c0_29 = arith.constant 0 : index
      %34 = vector.load %arg5[%c0_28, %c0_29] : memref<32x32xf32, #tpu.memory_space<vmem>>, vector<32x32xf32>
      %cst_30 = arith.constant dense<0.000000e+00> : vector<256x32xf32>
      %35 = tpu.matmul %33, %34, %cst_30 {dimension_numbers = #tpu.dot_dimension_numbers<[1], [0], [0], [1], [0, 0, 1, 1], [], []>} : vector<256x32xf32>, vector<32x32xf32>, vector<256x32xf32> -> vector<256x32xf32>
      %c0_31 = arith.constant 0 : index
      %c0_32 = arith.constant 0 : index
      %36 = vector.load %arg6[%c0_31, %c0_32] : memref<1x32xf32, #tpu.memory_space<vmem>>, vector<1x32xf32>
      %37 = vector.broadcast %36 : vector<1x32xf32> to vector<256x32xf32>
      %38 = arith.addf %35, %37 : vector<256x32xf32>
      %39 = vector.extract_strided_slice %38 {offsets = [0, 0], sizes = [256, 16], strides = [1, 1]} : vector<256x32xf32> to vector<256x16xf32>
      %c0_33 = arith.constant 0 : index
      %c0_34 = arith.constant 0 : index
      %c0_35 = arith.constant 0 : index
      %40 = vector.load %arg12[%c0_33, %c0_34, %c0_35] : memref<2x256x16xf32, #tpu.memory_space<vmem>>, vector<1x256x16xf32>
      %41 = vector.shape_cast %40 : vector<1x256x16xf32> to vector<256x16xf32>
      %42 = vector.shape_cast %39 : vector<256x16xf32> to vector<1x256x16xf32>
      tpu.vector_store %arg12[%c0_33, %c0_34, %c0_35], %42 {strides = array<i32>} : memref<2x256x16xf32, #tpu.memory_space<vmem>>, vector<1x256x16xf32>,
      %43 = vector.extract_strided_slice %38 {offsets = [0, 16], sizes = [256, 16], strides = [1, 1]} : vector<256x32xf32> to vector<256x16xf32>
      %c1_36 = arith.constant 1 : index
      %c0_37 = arith.constant 0 : index
      %c0_38 = arith.constant 0 : index
      %44 = vector.load %arg12[%c1_36, %c0_37, %c0_38] : memref<2x256x16xf32, #tpu.memory_space<vmem>>, vector<1x256x16xf32>
      %45 = vector.shape_cast %44 : vector<1x256x16xf32> to vector<256x16xf32>
      %46 = vector.shape_cast %43 : vector<256x16xf32> to vector<1x256x16xf32>
      tpu.vector_store %arg12[%c1_36, %c0_37, %c0_38], %46 {strides = array<i32>} : memref<2x256x16xf32, #tpu.memory_space<vmem>>, vector<1x256x16xf32>,
      %cst_39 = arith.constant 0.000000e+00 : f32
      %47 = vector.broadcast %cst_39 : f32 to vector<256x16xf32>
      %c0_40 = arith.constant 0 : index
      %c0_41 = arith.constant 0 : index
      %48 = vector.load %arg13[%c0_40, %c0_41] : memref<256x16xf32, #tpu.memory_space<vmem>>, vector<256x16xf32>
      tpu.vector_store %arg13[%c0_40, %c0_41], %47 {strides = array<i32>} : memref<256x16xf32, #tpu.memory_space<vmem>>, vector<256x16xf32>,
    } else {
    }
    %c0 = arith.constant 0 : index
    %c0_1 = arith.constant 0 : index
    %c0_2 = arith.constant 0 : index
    %3 = vector.load %arg7[%c0, %c0_1, %c0_2] : memref<1x256x18xf32, #tpu.memory_space<vmem>>, vector<1x256x18xf32>
    %4 = vector.shape_cast %3 : vector<1x256x18xf32> to vector<256x18xf32>
    %c0_3 = arith.constant 0 : index
    %c0_4 = arith.constant 0 : index
    %5 = vector.load %arg8[%c0_3, %c0_4] : memref<18x16xf32, #tpu.memory_space<vmem>>, vector<18x16xf32>
    %cst = arith.constant dense<0.000000e+00> : vector<256x16xf32>
    %6 = tpu.matmul %4, %5, %cst {dimension_numbers = #tpu.dot_dimension_numbers<[1], [0], [0], [1], [0, 0, 1, 1], [], []>} : vector<256x18xf32>, vector<18x16xf32>, vector<256x16xf32> -> vector<256x16xf32>
    %c0_5 = arith.constant 0 : index
    %c0_6 = arith.constant 0 : index
    %7 = vector.load %arg9[%c0_5, %c0_6] : memref<1x16xf32, #tpu.memory_space<vmem>>, vector<1x16xf32>
    %8 = vector.broadcast %7 : vector<1x16xf32> to vector<256x16xf32>
    %9 = arith.addf %6, %8 : vector<256x16xf32>
    %c0_7 = arith.constant 0 : index
    %c0_8 = arith.constant 0 : index
    %c0_9 = arith.constant 0 : index
    %10 = vector.load %arg10[%c0_7, %c0_8, %c0_9] : memref<1x256x16xf32, #tpu.memory_space<vmem>>, vector<1x256x16xf32>
    %11 = vector.shape_cast %10 : vector<1x256x16xf32> to vector<256x16xf32>
    %c0_10 = arith.constant 0 : index
    %c0_11 = arith.constant 0 : index
    %c0_12 = arith.constant 0 : index
    %12 = vector.load %arg12[%c0_10, %c0_11, %c0_12] : memref<2x256x16xf32, #tpu.memory_space<vmem>>, vector<1x256x16xf32>
    %13 = vector.shape_cast %12 : vector<1x256x16xf32> to vector<256x16xf32>
    %14 = arith.mulf %13, %11 : vector<256x16xf32>
    %c1 = arith.constant 1 : index
    %c0_13 = arith.constant 0 : index
    %c0_14 = arith.constant 0 : index
    %15 = vector.load %arg12[%c1, %c0_13, %c0_14] : memref<2x256x16xf32, #tpu.memory_space<vmem>>, vector<1x256x16xf32>
    %16 = vector.shape_cast %15 : vector<1x256x16xf32> to vector<256x16xf32>
    %17 = arith.addf %14, %16 : vector<256x16xf32>
    %18 = arith.subf %9, %17 : vector<256x16xf32>
    %c0_15 = arith.constant 0 : index
    %c0_16 = arith.constant 0 : index
    %19 = vector.load %arg13[%c0_15, %c0_16] : memref<256x16xf32, #tpu.memory_space<vmem>>, vector<256x16xf32>
    %20 = arith.mulf %18, %18 : vector<256x16xf32>
    %21 = arith.addf %19, %20 : vector<256x16xf32>
    %c0_17 = arith.constant 0 : index
    %c0_18 = arith.constant 0 : index
    %22 = vector.load %arg13[%c0_17, %c0_18] : memref<256x16xf32, #tpu.memory_space<vmem>>, vector<256x16xf32>
    tpu.vector_store %arg13[%c0_17, %c0_18], %21 {strides = array<i32>} : memref<256x16xf32, #tpu.memory_space<vmem>>, vector<256x16xf32>,
    %c1_i32 = arith.constant 1 : i32
    %23 = arith.cmpi eq, %arg1, %c1_i32 : i32
    %24 = arith.extui %23 : i1 to i32
    %c0_i32_19 = arith.constant 0 : i32
    %25 = arith.cmpi ne, %24, %c0_i32_19 : i32
    scf.if %25 {
      %c0_20 = arith.constant 0 : index
      %c0_21 = arith.constant 0 : index
      %26 = vector.load %arg13[%c0_20, %c0_21] : memref<256x16xf32, #tpu.memory_space<vmem>>, vector<256x16xf32>
      %cst_22 = arith.constant dense<0.000000e+00> : vector<16xf32>
      %27 = vector.multi_reduction <add>, %26, %cst_22 [0] : vector<256x16xf32> to vector<16xf32>
      %28 = vector.shape_cast %27 : vector<16xf32> to vector<1x16xf32>
      %c0_23 = arith.constant 0 : index
      %c0_24 = arith.constant 0 : index
      %29 = vector.load %arg11[%c0_23, %c0_24] : memref<1x16xf32, #tpu.memory_space<vmem>>, vector<1x16xf32>
      tpu.vector_store %arg11[%c0_23, %c0_24], %28 {strides = array<i32>} : memref<1x16xf32, #tpu.memory_space<vmem>>, vector<1x16xf32>,
    } else {
    }
    return
  }
  func.func @transform_0(%arg0: i32, %arg1: i32) -> (i32, i32) {
    %c0_i32 = arith.constant 0 : i32
    %c0_i32_0 = arith.constant 0 : i32
    return %arg0, %c0_i32 : i32, i32
  }
  func.func @transform_1(%arg0: i32, %arg1: i32) -> (i32, i32) {
    %c0_i32 = arith.constant 0 : i32
    %c0_i32_0 = arith.constant 0 : i32
    %c0_i32_1 = arith.constant 0 : i32
    return %c0_i32, %c0_i32_0 : i32, i32
  }
  func.func @transform_2(%arg0: i32, %arg1: i32) -> (i32, i32) {
    %c0_i32 = arith.constant 0 : i32
    %c0_i32_0 = arith.constant 0 : i32
    %c0_i32_1 = arith.constant 0 : i32
    return %c0_i32, %c0_i32_0 : i32, i32
  }
  func.func @transform_3(%arg0: i32, %arg1: i32) -> (i32, i32) {
    %c0_i32 = arith.constant 0 : i32
    %c0_i32_0 = arith.constant 0 : i32
    %c0_i32_1 = arith.constant 0 : i32
    return %c0_i32, %c0_i32_0 : i32, i32
  }
  func.func @transform_4(%arg0: i32, %arg1: i32) -> (i32, i32) {
    %c0_i32 = arith.constant 0 : i32
    %c0_i32_0 = arith.constant 0 : i32
    %c0_i32_1 = arith.constant 0 : i32
    return %c0_i32, %c0_i32_0 : i32, i32
  }
  func.func @transform_5(%arg0: i32, %arg1: i32) -> (i32, i32, i32) {
    %c0_i32 = arith.constant 0 : i32
    %c0_i32_0 = arith.constant 0 : i32
    return %arg1, %arg0, %c0_i32 : i32, i32, i32
  }
  func.func @transform_6(%arg0: i32, %arg1: i32) -> (i32, i32) {
    %c0_i32 = arith.constant 0 : i32
    %c0_i32_0 = arith.constant 0 : i32
    %c0_i32_1 = arith.constant 0 : i32
    return %c0_i32, %c0_i32_0 : i32, i32
  }
  func.func @transform_7(%arg0: i32, %arg1: i32) -> (i32, i32) {
    %c0_i32 = arith.constant 0 : i32
    %c0_i32_0 = arith.constant 0 : i32
    %c0_i32_1 = arith.constant 0 : i32
    return %c0_i32, %c0_i32_0 : i32, i32
  }
  func.func @transform_8(%arg0: i32, %arg1: i32) -> (i32, i32, i32) {
    %c0_i32 = arith.constant 0 : i32
    %c0_i32_0 = arith.constant 0 : i32
    return %arg1, %arg0, %c0_i32 : i32, i32, i32
  }
  func.func @transform_9(%arg0: i32, %arg1: i32) -> (i32, i32) {
    %c0_i32 = arith.constant 0 : i32
    %c0_i32_0 = arith.constant 0 : i32
    return %arg0, %c0_i32 : i32, i32
  }
}

</mosaic_0001>

<bundles_post_ra>
// kernel: tpu_custom_call.1
= control target key start
LH: loop header
LB: loop body
LE: loop exit
PB: predicated region body
PF: predicated region fallthrough
CT: control target
= control target key end

     0   :  { %14 = vsyncpa [#allocation5], 0  ;;  %s2828_s30 = smov 0   ;;  %s2830_s10 = smov 0   ;;  %s3588_s0 = inlined_call_operand.vmem [shape: f32[256,27], index: 0, kind: input, shape index: {}]   ;;  %s3589_s1 = inlined_call_operand.vmem [shape: f32[27,32], index: 1, kind: input, shape index: {}]   ;;  %s3590_s2 = inlined_call_operand.vmem [shape: f32[1,32], index: 2, kind: input, shape index: {}]   ;;  %s3591_s3 = inlined_call_operand.vmem [shape: f32[32,32], index: 3, kind: input, shape index: {}]   ;;  %s3592_s4 = inlined_call_operand.vmem [shape: f32[1,32], index: 4, kind: input, shape index: {}]   ;;  %s3593_s5 = inlined_call_operand.vmem [shape: f32[2,256,18], index: 5, kind: input, shape index: {}]   ;;  %s3594_s6 = inlined_call_operand.vmem [shape: f32[18,16], index: 6, kind: input, shape index: {}]   ;;  %s3595_s7 = inlined_call_operand.vmem [shape: f32[1,16], index: 7, kind: input, shape index: {}]   ;;  %s3596_s8 = inlined_call_operand.vmem [shape: f32[2,256,16], index: 8, kind: input, shape index: {}]   ;;  %s3597_s9 = inlined_call_operand.hbm [shape: f32[1,16], index: 9, kind: output, shape index: {}]  }
   0x1   :  { %s2832_s11 = smov 0  }
   0x2 LB: > { %s2269_s12 = sadd.s32 4294967295, %s2772_s11   ;;  %s29_s13 = sadd.s32 1, %s2768_s10  ;;  %s2772_s11 = sphi %s2832_s11, %s20_s11   ;;  %s2768_s10 = sphi %s2830_s10, %s3600_s10   ;;  %s2764_s30 = sphi %s2828_s30, %s3599_s30  }
   0x3   : > { %p30_p0 = scmp.ge.s32.totalorder %s29_s13, 2  ;;  %p2273_p1 = scmp.ge.s32.totalorder %s2772_s11, 1 }
   0x4   : > { %p335_p2 = scmp.lt.s32.totalorder %s2772_s11, 3 }
   0x5   : > { %s3602_s13 = smov (%p30_p0, %s29_s13), 0 }
   0x6   : > { %p336_p3 = pnand %p2273_p1, %p335_p2 }
   0x7   : > { %p391_p4 = scmp.lt.s32.totalorder (!%p336_p3), %s2764_s30, 1  ;;  %p2278_p5 = scmp.ne.s32.totalorder (!%p336_p3), %s2764_s30, 0 }
   0x8   : > { %339 = sbr.rel (%p336_p3) target bundleno = 996 (0x3e4), region = 56 }
   0xf   : > { %s392_s14 = scalar_select %p391_p4, %s2764_s30, 1 }
  0x10   : > { %413 = sbr.rel (%p2278_p5) target bundleno = 639 (0x27f), region = 60  ;;  %v446_v0 = vld [vmem:[%s3589_s1] sm:$0xff] (!%p2278_p5)  ;;  %v447_v1 = vld [vmem:[%s3589_s1 + $0x8] sm:$0xff] (!%p2278_p5)  ;;  %v448_v2 = vld [vmem:[%s3589_s1 + $0x10] sm:$0xff] (!%p2278_p5)  ;;  %vm554_vm0 = vcmask (!%p2278_p5), 1042432   ;;  %vm457_vm1 = vcmask (!%p2278_p5), 220160  }
  0x11   : > { %s2385_s15 = sshll.u32 %s392_s14, 8  ;;  %v2660_v3 = vpack.c.bf16 (!%p2278_p5), %v447_v1, %v446_v0  ;;  %v449_v4 = vld [vmem:[%s3589_s1 + $0x18] sm:$0x7] (!%p2278_p5)  ;;  %v414_v5 = vld [vmem:[%s3588_s0] sm:$0xff] (!%p2278_p5)  ;;  %vm2774_vm2 = vmmov (!%p2278_p5), 1   ;;  %v415_v7 = vld [vmem:[%s3588_s0 + $0x8] sm:$0xff] (!%p2278_p5) }
  0x12   : > { %s2854_s18 = scalar_lea.vmem %s3593_s5, %s2385_s15  ;;  %s2859_s21 = scalar_lea.vmem %s3596_s8, %s2385_s15  ;;  %v2664_v6 = vpack.c.bf16 (!%p2278_p5), %v449_v4, %v448_v2  ;;  %vm2665_vm3 = vmpackc.low (!%p2278_p5), %vm554_vm0, %vm2774_vm2  ;;  %2502 = vmatprep.mubr.msk.f32.mxu0 (!%p2278_p5), %vm457_vm1, %v414_v5  ;;  %v416_v8 = vld [vmem:[%s3588_s0 + $0x10] sm:$0xff] (!%p2278_p5)  ;;  %v417_v9 = vld [vmem:[%s3588_s0 + $0x18] sm:$0xff] (!%p2278_p5)  ;;  %vm826_vm4 = vcmask (!%p2278_p5), 261120   ;;  %vm1148_vm5 = vcmask (!%p2278_p5), 130048  }
  0x13   : > { %2661 = vmatprep.subr.bf16.mxu0 (!%p2278_p5), %v2660_v3  ;;  %v815_v10 = vld [vmem:[%s3591_s3] sm:$0xff] (!%p2278_p5)  ;;  %v816_v11 = vld [vmem:[%s3591_s3 + $0x8] sm:$0xff] (!%p2278_p5)  ;;  %v420_v15 = vld [vmem:[%s3588_s0 + $0x30] sm:$0xff] (!%p2278_p5)  ;;  %s2775_s22 = smov (!%p2278_p5), 112  }
  0x14   : > { %2663 = vmatpush3.bf16.msra.mxu0 (!%p2278_p5), %v2660_v3  ;;  %v418_v12 = vld [vmem:[%s3588_s0 + $0x20] sm:$0xff] (!%p2278_p5)  ;;  %v2670_v13 = vpack.c.bf16 (!%p2278_p5), %v816_v11, %v815_v10  ;;  %v419_v14 = vld [vmem:[%s3588_s0 + $0x28] sm:$0xff] (!%p2278_p5)  ;;  %v421_v16 = vld [vmem:[%s3588_s0 + $0x38] sm:$0xff] (!%p2278_p5) }
  0x15   : > { %2666 = vmatprep.subr.msk.bf16.mxu0 (!%p2278_p5), %vm2665_vm3, %v2664_v6  ;;  %v422_v17 = vld [vmem:[%s3588_s0 + $0x40] sm:$0xff] (!%p2278_p5)  ;;  %v423_v18 = vld [vmem:[%s3588_s0 + $0x48] sm:$0xff] (!%p2278_p5)  ;;  %v424_v19 = vld [vmem:[%s3588_s0 + $0x50] sm:$0xff] (!%p2278_p5) }
  0x16   : > { %2671 = vmatprep.subr.bf16.mxu1 (!%p2278_p5), %v2670_v13  ;;  %v425_v20 = vld [vmem:[%s3588_s0 + $0x58] sm:$0xff] (!%p2278_p5)  ;;  %v426_v21 = vld [vmem:[%s3588_s0 + $0x60] sm:$0xff] (!%p2278_p5)  ;;  %v427_v22 = vld [vmem:[%s3588_s0 + $0x68] sm:$0xff] (!%p2278_p5) }
  0x17   : > { %2673 = vmatpush3.bf16.msra.mxu1 %v2670_v13  ;;  %v428_v23 = vld [vmem:[%s3588_s0 + $0x70] sm:$0xff]  ;;  %v429_v24 = vld [vmem:[%s3588_s0 + $0x78] sm:$0xff]  ;;  %v430_v25 = vld [vmem:[%s3588_s0 + $0x80] sm:$0xff] }
  0x18   : > { %2669 = vmatpush3.bf16.msk.msra.mxu0 %vm2665_vm3, %v2664_v6  ;;  %v431_v26 = vld [vmem:[%s3588_s0 + $0x88] sm:$0xff]  ;;  %v432_v27 = vld [vmem:[%s3588_s0 + $0x90] sm:$0xff]  ;;  %v433_v28 = vld [vmem:[%s3588_s0 + $0x98] sm:$0xff] }
  0x19   : > { %v434_v29 = vld [vmem:[%s3588_s0 + $0xa0] sm:$0xff]  ;;  %v435_v30 = vld [vmem:[%s3588_s0 + $0xa8] sm:$0xff]  ;;  %v436_v31 = vld [vmem:[%s3588_s0 + $0xb0] sm:$0xff] }
  0x1a   : > { %v437_v32 = vld [vmem:[%s3588_s0 + $0xb8] sm:$0xff]  ;;  %v438_v33 = vld [vmem:[%s3588_s0 + $0xc0] sm:$0xff]  ;;  %v439_v34 = vld [vmem:[%s3588_s0 + $0xc8] sm:$0xff] }
  0x1b   : > { %2503 = vmatmul.mubr.msk.f32.vlgmr.msra.gmra.mrb[0].mxu0 %vm457_vm1, %v415_v7  ;;  %v440_v35 = vld [vmem:[%s3588_s0 + $0xd0] sm:$0xff]  ;;  %v441_v36 = vld [vmem:[%s3588_s0 + $0xd8] sm:$0xff]  ;;  %v442_v37 = vld [vmem:[%s3588_s0 + $0xe0] sm:$0xff] }
  0x1c   : > { %2505 = vmatprep.mubr.msk.f32.mxu0 %vm457_vm1, %v416_v8  ;;  %v443_v38 = vld [vmem:[%s3588_s0 + $0xe8] sm:$0xff]  ;;  %v444_v39 = vld [vmem:[%s3588_s0 + $0xf0] sm:$0xff]  ;;  %v445_v40 = vld [vmem:[%s3588_s0 + $0xf8] sm:$0xff] }
  0x1d   : > { %v817_v41 = vld [vmem:[%s3591_s3 + $0x10] sm:$0xff]  ;;  %v818_v42 = vld [vmem:[%s3591_s3 + $0x18] sm:$0xff]  ;;  %v3017_v44 = vld [vmem:[%s3590_s2] ss:$0 sm:$0xff] }
  0x1e   : > { %v2674_v43 = vpack.c.bf16 %v818_v42, %v817_v41 }
  0x1f   : > { %2506 = vmatmul.mubr.msk.f32.gmra.mrb[2].mxu0 %vm457_vm1, %v417_v9 }
  0x20   : > { %2508 = vmatprep.mubr.msk.f32.mxu0 %vm457_vm1, %v418_v12  ;;  %2675 = vmatprep.subr.bf16.mxu1 %v2674_v43 }
  0x21   : > { %2677 = vmatpush3.bf16.msra.mxu1 %v2674_v43 }
  0x23   : > { %2509 = vmatmul.mubr.msk.f32.gmra.mrb[4].mxu0 %vm457_vm1, %v419_v14 }
  0x24   : > { %2511 = vmatprep.mubr.msk.f32.mxu0 %vm457_vm1, %v420_v15 }
  0x27   : > { %2512 = vmatmul.mubr.msk.f32.gmra.mrb[6].mxu0 %vm457_vm1, %v421_v16 }
  0x28   : > { %2514 = vmatprep.mubr.msk.f32.mxu0 %vm457_vm1, %v422_v17 }
  0x2b   : > { %2515 = vmatmul.mubr.msk.f32.gmra.mrb[8].mxu0 %vm457_vm1, %v423_v18 }
  0x2c   : > { %2517 = vmatprep.mubr.msk.f32.mxu0 %vm457_vm1, %v424_v19 }
  0x2f   : > { %2518 = vmatmul.mubr.msk.f32.gmra.mrb[10].mxu0 %vm457_vm1, %v425_v20 }
  0x30   : > { %2520 = vmatprep.mubr.msk.f32.mxu0 %vm457_vm1, %v426_v21 }
  0x33   : > { %2521 = vmatmul.mubr.msk.f32.gmra.mrb[12].mxu0 %vm457_vm1, %v427_v22 }
  0x34   : > { %2523 = vmatprep.mubr.msk.f32.mxu0 %vm457_vm1, %v428_v23 }
  0x37   : > { %2524 = vmatmul.mubr.msk.f32.gmra.mrb[14].mxu0 %vm457_vm1, %v429_v24 }
  0x38   : > { %2526 = vmatprep.mubr.msk.f32.mxu0 %vm457_vm1, %v430_v25 }
  0x3b   : > { %2527 = vmatmul.mubr.msk.f32.gmra.mrb[16].mxu0 %vm457_vm1, %v431_v26 }
  0x3c   : > { %2529 = vmatprep.mubr.msk.f32.mxu0 %vm457_vm1, %v432_v27 }
  0x3f   : > { %2530 = vmatmul.mubr.msk.f32.gmra.mrb[18].mxu0 %vm457_vm1, %v433_v28 }
  0x40   : > { %2532 = vmatprep.mubr.msk.f32.mxu0 %vm457_vm1, %v434_v29 }
  0x43   : > { %2533 = vmatmul.mubr.msk.f32.gmra.mrb[20].mxu0 %vm457_vm1, %v435_v30 }
  0x44   : > { %2535 = vmatprep.mubr.msk.f32.mxu0 %vm457_vm1, %v436_v31 }
  0x47   : > { %2536 = vmatmul.mubr.msk.f32.gmra.mrb[22].mxu0 %vm457_vm1, %v437_v32 }
  0x48   : > { %2538 = vmatprep.mubr.msk.f32.mxu0 %vm457_vm1, %v438_v33 }
  0x4b   : > { %2539 = vmatmul.mubr.msk.f32.gmra.mrb[24].mxu0 %vm457_vm1, %v439_v34 }
  0x4c   : > { %2541 = vmatprep.mubr.msk.f32.mxu0 %vm457_vm1, %v440_v35 }
  0x4f   : > { %2542 = vmatmul.mubr.msk.f32.gmra.mrb[26].mxu0 %vm457_vm1, %v441_v36 }
  0x50   : > { %2544 = vmatprep.mubr.msk.f32.mxu0 %vm457_vm1, %v442_v37 }
  0x53   : > { %2545 = vmatmul.mubr.msk.f32.gmra.mrb[28].mxu0 %vm457_vm1, %v443_v38 }
  0x54   : > { %2547 = vmatprep.mubr.msk.f32.mxu0 %vm457_vm1, %v444_v39 }
  0x57   : > { %2548 = vmatmul.mubr.msk.f32.gmra.mrb[30].mxu0 %vm457_vm1, %v445_v40 }
  0xee   : > { %v2504_v45 = vpop.f32.mrb[0].mxu0 }
  0xef   : > { %v630_v46 = vadd.f32 %v2504_v45, %v3017_v44  ;;  %v624_v47 = vpop.f32.mrb[1].mxu0 }
  0xf0   : > { %v625_v48 = vadd.f32 %v3017_v44, %v624_v47 }
  0xf1   : > { %v784_v51 = vmax.f32 %v630_v46, 0.0 }
  0xf2   : > { %v783_v49 = vmax.f32 %v625_v48, 0.0  ;;  %v2507_v50 = vpop.f32.mrb[2].mxu0 }
  0xf3   : > { %v640_v52 = vadd.f32 %v2507_v50, %v3017_v44  ;;  %v634_v53 = vpop.f32.mrb[3].mxu0 }
  0xf4   : > { %v635_v54 = vadd.f32 %v3017_v44, %v634_v53  ;;  %2558 = vmatprep.mubr.msk.f32.mxu1 %vm826_vm4, %v783_v49 }
  0xf5   : > { %2559 = vmatmul.mubr.msk.f32.vlgmr.msra.gmra.mrb[0].mxu1 %vm826_vm4, %v784_v51  ;;  %v786_v57 = vmax.f32 %v640_v52, 0.0 }
  0xf6   : > { %v785_v55 = vmax.f32 %v635_v54, 0.0  ;;  %v2510_v56 = vpop.f32.mrb[4].mxu0 }
  0xf7   : > { %v650_v58 = vadd.f32 %v2510_v56, %v3017_v44  ;;  %v644_v59 = vpop.f32.mrb[5].mxu0 }
  0xf8   : > { %v645_v60 = vadd.f32 %v3017_v44, %v644_v59  ;;  %2561 = vmatprep.mubr.msk.f32.mxu1 %vm826_vm4, %v785_v55 }
  0xf9   : > { %v788_v61 = vmax.f32 %v650_v58, 0.0  ;;  %2562 = vmatmul.mubr.msk.f32.gmra.mrb[2].mxu1 %vm826_vm4, %v786_v57 }
  0xfa   : > { %v787_v62 = vmax.f32 %v645_v60, 0.0  ;;  %v2513_v63 = vpop.f32.mrb[6].mxu0 }
  0xfb   : > { %v660_v0 = vadd.f32 %v2513_v63, %v3017_v44  ;;  %v654_v1 = vpop.f32.mrb[7].mxu0 }
  0xfc   : > { %v655_v2 = vadd.f32 %v3017_v44, %v654_v1  ;;  %2564 = vmatprep.mubr.msk.f32.mxu1 %vm826_vm4, %v787_v62 }
  0xfd   : > { %v790_v3 = vmax.f32 %v660_v0, 0.0  ;;  %2565 = vmatmul.mubr.msk.f32.gmra.mrb[4].mxu1 %vm826_vm4, %v788_v61 }
  0xfe   : > { %v789_v4 = vmax.f32 %v655_v2, 0.0  ;;  %v2516_v5 = vpop.f32.mrb[8].mxu0 }
  0xff   : > { %v670_v6 = vadd.f32 %v2516_v5, %v3017_v44  ;;  %v664_v7 = vpop.f32.mrb[9].mxu0 }
 0x100   : > { %v665_v8 = vadd.f32 %v3017_v44, %v664_v7  ;;  %2567 = vmatprep.mubr.msk.f32.mxu1 %vm826_vm4, %v789_v4 }
 0x101   : > { %v792_v9 = vmax.f32 %v670_v6, 0.0  ;;  %2568 = vmatmul.mubr.msk.f32.gmra.mrb[6].mxu1 %vm826_vm4, %v790_v3 }
 0x102   : > { %v791_v10 = vmax.f32 %v665_v8, 0.0  ;;  %v2519_v11 = vpop.f32.mrb[10].mxu0 }
 0x103   : > { %v680_v12 = vadd.f32 %v2519_v11, %v3017_v44  ;;  %v674_v13 = vpop.f32.mrb[11].mxu0 }
 0x104   : > { %v675_v14 = vadd.f32 %v3017_v44, %v674_v13  ;;  %2570 = vmatprep.mubr.msk.f32.mxu1 %vm826_vm4, %v791_v10 }
 0x105   : > { %v794_v15 = vmax.f32 %v680_v12, 0.0  ;;  %2571 = vmatmul.mubr.msk.f32.gmra.mrb[8].mxu1 %vm826_vm4, %v792_v9 }
 0x106   : > { %v793_v16 = vmax.f32 %v675_v14, 0.0  ;;  %v2522_v17 = vpop.f32.mrb[12].mxu0  ;;  %v3086_v14 = vld [vmem:[%s3592_s4] ss:$0 sm:$0xff] }
 0x107   : > { %v690_v18 = vadd.f32 %v2522_v17, %v3017_v44  ;;  %v684_v19 = vpop.f32.mrb[13].mxu0 }
 0x108   : > { %v685_v20 = vadd.f32 %v3017_v44, %v684_v19  ;;  %2573 = vmatprep.mubr.msk.f32.mxu1 %vm826_vm4, %v793_v16 }
 0x109   : > { %v796_v21 = vmax.f32 %v690_v18, 0.0  ;;  %2574 = vmatmul.mubr.msk.f32.gmra.mrb[10].mxu1 %vm826_vm4, %v794_v15 }
 0x10a   : > { %v795_v22 = vmax.f32 %v685_v20, 0.0  ;;  %v2525_v23 = vpop.f32.mrb[14].mxu0 }
 0x10b   : > { %v700_v24 = vadd.f32 %v2525_v23, %v3017_v44  ;;  %v694_v25 = vpop.f32.mrb[15].mxu0 }
 0x10c   : > { %v695_v26 = vadd.f32 %v3017_v44, %v694_v25  ;;  %2576 = vmatprep.mubr.msk.f32.mxu1 %vm826_vm4, %v795_v22 }
 0x10d   : > { %v798_v27 = vmax.f32 %v700_v24, 0.0  ;;  %2577 = vmatmul.mubr.msk.f32.gmra.mrb[12].mxu1 %vm826_vm4, %v796_v21 }
 0x10e   : > { %v797_v28 = vmax.f32 %v695_v26, 0.0  ;;  %v2528_v29 = vpop.f32.mrb[16].mxu0 }
 0x10f   : > { %v710_v30 = vadd.f32 %v2528_v29, %v3017_v44  ;;  %v704_v31 = vpop.f32.mrb[17].mxu0 }
 0x110   : > { %v705_v32 = vadd.f32 %v3017_v44, %v704_v31  ;;  %2579 = vmatprep.mubr.msk.f32.mxu1 %vm826_vm4, %v797_v28 }
 0x111   : > { %v800_v33 = vmax.f32 %v710_v30, 0.0  ;;  %2580 = vmatmul.mubr.msk.f32.gmra.mrb[14].mxu1 %vm826_vm4, %v798_v27 }
 0x112   : > { %v799_v34 = vmax.f32 %v705_v32, 0.0  ;;  %v2531_v35 = vpop.f32.mrb[18].mxu0 }
 0x113   : > { %v720_v36 = vadd.f32 %v2531_v35, %v3017_v44  ;;  %v714_v37 = vpop.f32.mrb[19].mxu0 }
 0x114   : > { %v715_v38 = vadd.f32 %v3017_v44, %v714_v37  ;;  %2582 = vmatprep.mubr.msk.f32.mxu1 %vm826_vm4, %v799_v34 }
 0x115   : > { %v802_v39 = vmax.f32 %v720_v36, 0.0  ;;  %2583 = vmatmul.mubr.msk.f32.gmra.mrb[16].mxu1 %vm826_vm4, %v800_v33 }
 0x116   : > { %v801_v40 = vmax.f32 %v715_v38, 0.0  ;;  %v2534_v41 = vpop.f32.mrb[20].mxu0 }
 0x117   : > { %v730_v42 = vadd.f32 %v2534_v41, %v3017_v44  ;;  %v724_v43 = vpop.f32.mrb[21].mxu0 }
 0x118   : > { %v725_v45 = vadd.f32 %v3017_v44, %v724_v43  ;;  %2585 = vmatprep.mubr.msk.f32.mxu1 %vm826_vm4, %v801_v40 }
 0x119   : > { %v804_v46 = vmax.f32 %v730_v42, 0.0  ;;  %2586 = vmatmul.mubr.msk.f32.gmra.mrb[18].mxu1 %vm826_vm4, %v802_v39 }
 0x11a   : > { %v803_v47 = vmax.f32 %v725_v45, 0.0  ;;  %v2537_v48 = vpop.f32.mrb[22].mxu0 }
 0x11b   : > { %v740_v49 = vadd.f32 %v2537_v48, %v3017_v44  ;;  %v734_v50 = vpop.f32.mrb[23].mxu0 }
 0x11c   : > { %v735_v51 = vadd.f32 %v3017_v44, %v734_v50  ;;  %2588 = vmatprep.mubr.msk.f32.mxu1 %vm826_vm4, %v803_v47 }
 0x11d   : > { %v806_v52 = vmax.f32 %v740_v49, 0.0  ;;  %2589 = vmatmul.mubr.msk.f32.gmra.mrb[20].mxu1 %vm826_vm4, %v804_v46 }
 0x11e   : > { %v805_v53 = vmax.f32 %v735_v51, 0.0  ;;  %v2540_v54 = vpop.f32.mrb[24].mxu0 }
 0x11f   : > { %v750_v55 = vadd.f32 %v2540_v54, %v3017_v44  ;;  %v744_v56 = vpop.f32.mrb[25].mxu0 }
 0x120   : > { %v745_v57 = vadd.f32 %v3017_v44, %v744_v56  ;;  %2591 = vmatprep.mubr.msk.f32.mxu1 %vm826_vm4, %v805_v53 }
 0x121   : > { %v808_v58 = vmax.f32 %v750_v55, 0.0  ;;  %2592 = vmatmul.mubr.msk.f32.gmra.mrb[22].mxu1 %vm826_vm4, %v806_v52 }
 0x122   : > { %v807_v59 = vmax.f32 %v745_v57, 0.0  ;;  %v2543_v60 = vpop.f32.mrb[26].mxu0 }
 0x123   : > { %v760_v61 = vadd.f32 %v2543_v60, %v3017_v44  ;;  %v754_v62 = vpop.f32.mrb[27].mxu0 }
 0x124   : > { %v755_v63 = vadd.f32 %v3017_v44, %v754_v62  ;;  %2594 = vmatprep.mubr.msk.f32.mxu1 %vm826_vm4, %v807_v59 }
 0x125   : > { %v810_v0 = vmax.f32 %v760_v61, 0.0  ;;  %2595 = vmatmul.mubr.msk.f32.gmra.mrb[24].mxu1 %vm826_vm4, %v808_v58 }
 0x126   : > { %v809_v1 = vmax.f32 %v755_v63, 0.0  ;;  %v2546_v2 = vpop.f32.mrb[28].mxu0 }
 0x127   : > { %v770_v3 = vadd.f32 %v2546_v2, %v3017_v44  ;;  %v764_v4 = vpop.f32.mrb[29].mxu0 }
 0x128   : > { %v765_v5 = vadd.f32 %v3017_v44, %v764_v4  ;;  %2597 = vmatprep.mubr.msk.f32.mxu1 %vm826_vm4, %v809_v1 }
 0x129   : > { %v812_v6 = vmax.f32 %v770_v3, 0.0  ;;  %2598 = vmatmul.mubr.msk.f32.gmra.mrb[26].mxu1 %vm826_vm4, %v810_v0 }
 0x12a   : > { %v811_v7 = vmax.f32 %v765_v5, 0.0  ;;  %v2549_v8 = vpop.f32.mrb[30].mxu0 }
 0x12b   : > { %v780_v9 = vadd.f32 %v2549_v8, %v3017_v44  ;;  %v774_v10 = vpop.f32.mrb[31].mxu0 }
 0x12c   : > { %v775_v11 = vadd.f32 %v3017_v44, %v774_v10  ;;  %2600 = vmatprep.mubr.msk.f32.mxu1 %vm826_vm4, %v811_v7  ;;  %v2776_v7 = vmov 0.0  }
 0x12d   : > { %v814_v12 = vmax.f32 %v780_v9, 0.0  ;;  %2601 = vmatmul.mubr.msk.f32.gmra.mrb[28].mxu1 %vm826_vm4, %v812_v6  ;;  %1342 = vst.msk [vmem:[#allocation3] sm:$0xff] %vm1148_vm5, %v2776_v7  ;;  %1343 = vst.msk [vmem:[#allocation3 + $0x8] sm:$0xff] %vm1148_vm5, %v2776_v7 }
 0x12e   : > { %v813_v13 = vmax.f32 %v775_v11, 0.0  ;;  %1344 = vst.msk [vmem:[#allocation3 + $0x10] sm:$0xff] %vm1148_vm5, %v2776_v7  ;;  %1345 = vst.msk [vmem:[#allocation3 + $0x18] sm:$0xff] %vm1148_vm5, %v2776_v7 }
 0x12f   : > { %1346 = vst.msk [vmem:[#allocation3 + $0x20] sm:$0xff] %vm1148_vm5, %v2776_v7  ;;  %1347 = vst.msk [vmem:[#allocation3 + $0x28] sm:$0xff] %vm1148_vm5, %v2776_v7 }
 0x130   : > { %2603 = vmatprep.mubr.msk.f32.mxu1 %vm826_vm4, %v813_v13  ;;  %1348 = vst.msk [vmem:[#allocation3 + $0x30] sm:$0xff] %vm1148_vm5, %v2776_v7  ;;  %1349 = vst.msk [vmem:[#allocation3 + $0x38] sm:$0xff] %vm1148_vm5, %v2776_v7 }
 0x131   : > { %2604 = vmatmul.mubr.msk.f32.gmra.mrb[30].mxu1 %vm826_vm4, %v814_v12  ;;  %1350 = vst.msk [vmem:[#allocation3 + $0x40] sm:$0xff] %vm1148_vm5, %v2776_v7  ;;  %1351 = vst.msk [vmem:[#allocation3 + $0x48] sm:$0xff] %vm1148_vm5, %v2776_v7 }
 0x132   : > { %1352 = vst.msk [vmem:[#allocation3 + $0x50] sm:$0xff] %vm1148_vm5, %v2776_v7  ;;  %1353 = vst.msk [vmem:[#allocation3 + $0x58] sm:$0xff] %vm1148_vm5, %v2776_v7 }
 0x133   : > { %1354 = vst.msk [vmem:[#allocation3 + $0x60] sm:$0xff] %vm1148_vm5, %v2776_v7  ;;  %1355 = vst.msk [vmem:[#allocation3 + $0x68] sm:$0xff] %vm1148_vm5, %v2776_v7 }
 0x134   : > { %1356 = vst.msk [vmem:[#allocation3 + $0x70] sm:$0xff] %vm1148_vm5, %v2776_v7  ;;  %1357 = vst.msk [vmem:[#allocation3 + $0x78] sm:$0xff] %vm1148_vm5, %v2776_v7 }
 0x135   : > { %1358 = vst.msk [vmem:[#allocation3 + $0x80] sm:$0xff] %vm1148_vm5, %v2776_v7  ;;  %1359 = vst.msk [vmem:[#allocation3 + $0x88] sm:$0xff] %vm1148_vm5, %v2776_v7 }
 0x136   : > { %1360 = vst.msk [vmem:[#allocation3 + $0x90] sm:$0xff] %vm1148_vm5, %v2776_v7  ;;  %1361 = vst.msk [vmem:[#allocation3 + $0x98] sm:$0xff] %vm1148_vm5, %v2776_v7 }
 0x137   : > { %1362 = vst.msk [vmem:[#allocation3 + $0xa0] sm:$0xff] %vm1148_vm5, %v2776_v7  ;;  %1363 = vst.msk [vmem:[#allocation3 + $0xa8] sm:$0xff] %vm1148_vm5, %v2776_v7 }
 0x138   : > { %1364 = vst.msk [vmem:[#allocation3 + $0xb0] sm:$0xff] %vm1148_vm5, %v2776_v7  ;;  %1365 = vst.msk [vmem:[#allocation3 + $0xb8] sm:$0xff] %vm1148_vm5, %v2776_v7 }
 0x139   : > { %1366 = vst.msk [vmem:[#allocation3 + $0xc0] sm:$0xff] %vm1148_vm5, %v2776_v7  ;;  %1367 = vst.msk [vmem:[#allocation3 + $0xc8] sm:$0xff] %vm1148_vm5, %v2776_v7 }
 0x13a   : > { %1368 = vst.msk [vmem:[#allocation3 + $0xd0] sm:$0xff] %vm1148_vm5, %v2776_v7  ;;  %1369 = vst.msk [vmem:[#allocation3 + $0xd8] sm:$0xff] %vm1148_vm5, %v2776_v7 }
 0x13b   : > { %1370 = vst.msk [vmem:[#allocation3 + $0xe0] sm:$0xff] %vm1148_vm5, %v2776_v7  ;;  %1371 = vst.msk [vmem:[#allocation3 + $0xe8] sm:$0xff] %vm1148_vm5, %v2776_v7 }
 0x13c   : > { %1372 = vst.msk [vmem:[#allocation3 + $0xf0] sm:$0xff] %vm1148_vm5, %v2776_v7  ;;  %1373 = vst.msk [vmem:[#allocation3 + $0xf8] sm:$0xff] %vm1148_vm5, %v2776_v7 }
 0x1c8   : > { %v2560_v15 = vpop.f32.mrb[0].mxu1 }
 0x1c9   : > { %v995_v16 = vadd.f32 %v2560_v15, %v3086_v14  ;;  %v989_v44 = vpop.f32.mrb[1].mxu1 }
 0x1ca   : > { %v990_v17 = vadd.f32 %v3086_v14, %v989_v44 }
 0x1cb   : > { %1150 = vst.msk [vmem:[#allocation2 + $0x8] sm:$0xff] %vm1148_vm5, %v995_v16  ;;  %1215 = vrot.lane.b32.xlu0 %v995_v16, %s2775_s22 }
 0x1cc   : > { %1149 = vst.msk [vmem:[#allocation2] sm:$0xff] %vm1148_vm5, %v990_v17  ;;  %v2563_v18 = vpop.f32.mrb[2].mxu1 }
 0x1cd   : > { %v1005_v19 = vadd.f32 %v2563_v18, %v3086_v14  ;;  %v999_v20 = vpop.f32.mrb[3].mxu1 }
 0x1ce   : > { %v1000_v21 = vadd.f32 %v3086_v14, %v999_v20 }
 0x1cf   : > { %1152 = vst.msk [vmem:[#allocation2 + $0x18] sm:$0xff] %vm1148_vm5, %v1005_v19  ;;  %1219 = vrot.lane.b32.xlu1 %v1005_v19, %s2775_s22  ;;  %1213 = vrot.lane.b32.xlu0 %v990_v17, %s2775_s22 }
 0x1d0   : > { %1151 = vst.msk [vmem:[#allocation2 + $0x10] sm:$0xff] %vm1148_vm5, %v1000_v21  ;;  %v2566_v22 = vpop.f32.mrb[4].mxu1 }
 0x1d1   : > { %v1015_v23 = vadd.f32 %v2566_v22, %v3086_v14  ;;  %v1009_v24 = vpop.f32.mrb[5].mxu1 }
 0x1d2   : > { %v1010_v25 = vadd.f32 %v3086_v14, %v1009_v24 }
 0x1d3   : > { %1154 = vst.msk [vmem:[#allocation2 + $0x28] sm:$0xff] %vm1148_vm5, %v1015_v23  ;;  %1217 = vrot.lane.b32.xlu1 %v1000_v21, %s2775_s22 }
 0x1d4   : > { %1153 = vst.msk [vmem:[#allocation2 + $0x20] sm:$0xff] %vm1148_vm5, %v1010_v25  ;;  %v2569_v26 = vpop.f32.mrb[6].mxu1  ;;  %1221 = vrot.lane.b32.xlu0 %v1010_v25, %s2775_s22 }
 0x1d5   : > { %v1025_v27 = vadd.f32 %v2569_v26, %v3086_v14  ;;  %v1019_v28 = vpop.f32.mrb[7].mxu1 }
 0x1d6   : > { %v1020_v29 = vadd.f32 %v3086_v14, %v1019_v28 }
 0x1d7   : > { %1156 = vst.msk [vmem:[#allocation2 + $0x38] sm:$0xff] %vm1148_vm5, %v1025_v27  ;;  %1223 = vrot.lane.b32.xlu1 %v1015_v23, %s2775_s22 }
 0x1d8   : > { %1155 = vst.msk [vmem:[#allocation2 + $0x30] sm:$0xff] %vm1148_vm5, %v1020_v29  ;;  %v2572_v30 = vpop.f32.mrb[8].mxu1  ;;  %1225 = vrot.lane.b32.xlu0 %v1020_v29, %s2775_s22 }
 0x1d9   : > { %v1035_v31 = vadd.f32 %v2572_v30, %v3086_v14  ;;  %v1029_v32 = vpop.f32.mrb[9].mxu1 }
 0x1da   : > { %v1030_v33 = vadd.f32 %v3086_v14, %v1029_v32 }
 0x1db   : > { %1158 = vst.msk [vmem:[#allocation2 + $0x48] sm:$0xff] %vm1148_vm5, %v1035_v31  ;;  %1227 = vrot.lane.b32.xlu1 %v1025_v27, %s2775_s22 }
 0x1dc   : > { %1157 = vst.msk [vmem:[#allocation2 + $0x40] sm:$0xff] %vm1148_vm5, %v1030_v33  ;;  %v2575_v34 = vpop.f32.mrb[10].mxu1  ;;  %1229 = vrot.lane.b32.xlu0 %v1030_v33, %s2775_s22 }
 0x1dd   : > { %v1045_v35 = vadd.f32 %v2575_v34, %v3086_v14  ;;  %v1039_v36 = vpop.f32.mrb[11].mxu1 }
 0x1de   : > { %v1040_v37 = vadd.f32 %v3086_v14, %v1039_v36 }
 0x1df   : > { %1160 = vst.msk [vmem:[#allocation2 + $0x58] sm:$0xff] %vm1148_vm5, %v1045_v35  ;;  %1231 = vrot.lane.b32.xlu1 %v1035_v31, %s2775_s22 }
 0x1e0   : > { %1159 = vst.msk [vmem:[#allocation2 + $0x50] sm:$0xff] %vm1148_vm5, %v1040_v37  ;;  %v2578_v38 = vpop.f32.mrb[12].mxu1  ;;  %1233 = vrot.lane.b32.xlu0 %v1040_v37, %s2775_s22 }
 0x1e1   : > { %v1055_v39 = vadd.f32 %v2578_v38, %v3086_v14  ;;  %v1049_v40 = vpop.f32.mrb[13].mxu1 }
 0x1e2   : > { %v1050_v41 = vadd.f32 %v3086_v14, %v1049_v40 }
 0x1e3   : > { %1162 = vst.msk [vmem:[#allocation2 + $0x68] sm:$0xff] %vm1148_vm5, %v1055_v39  ;;  %1235 = vrot.lane.b32.xlu1 %v1045_v35, %s2775_s22 }
 0x1e4   : > { %1161 = vst.msk [vmem:[#allocation2 + $0x60] sm:$0xff] %vm1148_vm5, %v1050_v41  ;;  %v2581_v42 = vpop.f32.mrb[14].mxu1  ;;  %1237 = vrot.lane.b32.xlu0 %v1050_v41, %s2775_s22 }
 0x1e5   : > { %v1065_v43 = vadd.f32 %v2581_v42, %v3086_v14  ;;  %v1059_v45 = vpop.f32.mrb[15].mxu1 }
 0x1e6   : > { %v1060_v46 = vadd.f32 %v3086_v14, %v1059_v45 }
 0x1e7   : > { %1164 = vst.msk [vmem:[#allocation2 + $0x78] sm:$0xff] %vm1148_vm5, %v1065_v43  ;;  %1239 = vrot.lane.b32.xlu1 %v1055_v39, %s2775_s22 }
 0x1e8   : > { %1163 = vst.msk [vmem:[#allocation2 + $0x70] sm:$0xff] %vm1148_vm5, %v1060_v46  ;;  %v2584_v47 = vpop.f32.mrb[16].mxu1  ;;  %1241 = vrot.lane.b32.xlu0 %v1060_v46, %s2775_s22 }
 0x1e9   : > { %v1075_v48 = vadd.f32 %v2584_v47, %v3086_v14  ;;  %v1069_v49 = vpop.f32.mrb[17].mxu1 }
 0x1ea   : > { %v1070_v50 = vadd.f32 %v3086_v14, %v1069_v49 }
 0x1eb   : > { %1166 = vst.msk [vmem:[#allocation2 + $0x88] sm:$0xff] %vm1148_vm5, %v1075_v48  ;;  %1243 = vrot.lane.b32.xlu1 %v1065_v43, %s2775_s22 }
 0x1ec   : > { %1165 = vst.msk [vmem:[#allocation2 + $0x80] sm:$0xff] %vm1148_vm5, %v1070_v50  ;;  %v2587_v51 = vpop.f32.mrb[18].mxu1  ;;  %1245 = vrot.lane.b32.xlu0 %v1070_v50, %s2775_s22 }
 0x1ed   : > { %v1085_v52 = vadd.f32 %v2587_v51, %v3086_v14  ;;  %v1079_v53 = vpop.f32.mrb[19].mxu1 }
 0x1ee   : > { %v1080_v54 = vadd.f32 %v3086_v14, %v1079_v53 }
 0x1ef   : > { %1168 = vst.msk [vmem:[#allocation2 + $0x98] sm:$0xff] %vm1148_vm5, %v1085_v52  ;;  %1247 = vrot.lane.b32.xlu1 %v1075_v48, %s2775_s22 }
 0x1f0   : > { %1167 = vst.msk [vmem:[#allocation2 + $0x90] sm:$0xff] %vm1148_vm5, %v1080_v54  ;;  %v2590_v55 = vpop.f32.mrb[20].mxu1  ;;  %1249 = vrot.lane.b32.xlu0 %v1080_v54, %s2775_s22 }
 0x1f1   : > { %v1095_v56 = vadd.f32 %v2590_v55, %v3086_v14  ;;  %v1089_v57 = vpop.f32.mrb[21].mxu1 }
 0x1f2   : > { %v1090_v58 = vadd.f32 %v3086_v14, %v1089_v57 }
 0x1f3   : > { %1170 = vst.msk [vmem:[#allocation2 + $0xa8] sm:$0xff] %vm1148_vm5, %v1095_v56  ;;  %1251 = vrot.lane.b32.xlu1 %v1085_v52, %s2775_s22 }
 0x1f4   : > { %1169 = vst.msk [vmem:[#allocation2 + $0xa0] sm:$0xff] %vm1148_vm5, %v1090_v58  ;;  %v2593_v59 = vpop.f32.mrb[22].mxu1  ;;  %1253 = vrot.lane.b32.xlu0 %v1090_v58, %s2775_s22 }
 0x1f5   : > { %v1105_v60 = vadd.f32 %v2593_v59, %v3086_v14  ;;  %v1099_v61 = vpop.f32.mrb[23].mxu1 }
 0x1f6   : > { %v1100_v62 = vadd.f32 %v3086_v14, %v1099_v61 }
 0x1f7   : > { %1172 = vst.msk [vmem:[#allocation2 + $0xb8] sm:$0xff] %vm1148_vm5, %v1105_v60  ;;  %1255 = vrot.lane.b32.xlu1 %v1095_v56, %s2775_s22 }
 0x1f8   : > { %1171 = vst.msk [vmem:[#allocation2 + $0xb0] sm:$0xff] %vm1148_vm5, %v1100_v62  ;;  %v2596_v63 = vpop.f32.mrb[24].mxu1  ;;  %1257 = vrot.lane.b32.xlu0 %v1100_v62, %s2775_s22 }
 0x1f9   : > { %v1115_v0 = vadd.f32 %v2596_v63, %v3086_v14  ;;  %v1109_v1 = vpop.f32.mrb[25].mxu1 }
 0x1fa   : > { %v1110_v2 = vadd.f32 %v3086_v14, %v1109_v1 }
 0x1fb   : > { %1174 = vst.msk [vmem:[#allocation2 + $0xc8] sm:$0xff] %vm1148_vm5, %v1115_v0  ;;  %1259 = vrot.lane.b32.xlu1 %v1105_v60, %s2775_s22 }
 0x1fc   : > { %1173 = vst.msk [vmem:[#allocation2 + $0xc0] sm:$0xff] %vm1148_vm5, %v1110_v2  ;;  %v2599_v3 = vpop.f32.mrb[26].mxu1  ;;  %1261 = vrot.lane.b32.xlu0 %v1110_v2, %s2775_s22 }
 0x1fd   : > { %v1125_v4 = vadd.f32 %v2599_v3, %v3086_v14  ;;  %v1119_v5 = vpop.f32.mrb[27].mxu1 }
 0x1fe   : > { %v1120_v6 = vadd.f32 %v3086_v14, %v1119_v5 }
 0x1ff   : > { %1176 = vst.msk [vmem:[#allocation2 + $0xd8] sm:$0xff] %vm1148_vm5, %v1125_v4  ;;  %1263 = vrot.lane.b32.xlu1 %v1115_v0, %s2775_s22 }
 0x200   : > { %1175 = vst.msk [vmem:[#allocation2 + $0xd0] sm:$0xff] %vm1148_vm5, %v1120_v6  ;;  %v2602_v8 = vpop.f32.mrb[28].mxu1  ;;  %1265 = vrot.lane.b32.xlu0 %v1120_v6, %s2775_s22 }
 0x201   : > { %v1135_v9 = vadd.f32 %v2602_v8, %v3086_v14  ;;  %v1129_v10 = vpop.f32.mrb[29].mxu1 }
 0x202   : > { %v1130_v11 = vadd.f32 %v3086_v14, %v1129_v10 }
 0x203   : > { %1178 = vst.msk [vmem:[#allocation2 + $0xe8] sm:$0xff] %vm1148_vm5, %v1135_v9  ;;  %1267 = vrot.lane.b32.xlu1 %v1125_v4, %s2775_s22 }
 0x204   : > { %1177 = vst.msk [vmem:[#allocation2 + $0xe0] sm:$0xff] %vm1148_vm5, %v1130_v11  ;;  %v2605_v12 = vpop.f32.mrb[30].mxu1  ;;  %1269 = vrot.lane.b32.xlu0 %v1130_v11, %s2775_s22 }
 0x205   : > { %v1145_v13 = vadd.f32 %v2605_v12, %v3086_v14  ;;  %v1139_v15 = vpop.f32.mrb[31].mxu1 }
 0x206   : > { %v1140_v16 = vadd.f32 %v3086_v14, %v1139_v15 }
 0x207   : > { %1180 = vst.msk [vmem:[#allocation2 + $0xf8] sm:$0xff] %vm1148_vm5, %v1145_v13  ;;  %1271 = vrot.lane.b32.xlu1 %v1135_v9, %s2775_s22 }
 0x208   : > { %1179 = vst.msk [vmem:[#allocation2 + $0xf0] sm:$0xff] %vm1148_vm5, %v1140_v16  ;;  %1273 = vrot.lane.b32.xlu0 %v1140_v16, %s2775_s22 }
 0x20b   : > { %1275 = vrot.lane.b32.xlu1 %v1145_v13, %s2775_s22 }
 0x23d   : > { %v1216_v44 = vpop.permute.xlu0 %1215 }
 0x23e   : > { %1311 = vst.msk [vmem:[#allocation2 + $0x108] sm:$0xff] %vm1148_vm5, %v1216_v44 }
 0x241   : > { %v1220_v17 = vpop.permute.xlu1 %1219  ;;  %v1214_v18 = vpop.permute.xlu0 %1213 }
 0x242   : > { %1313 = vst.msk [vmem:[#allocation2 + $0x118] sm:$0xff] %vm1148_vm5, %v1220_v17  ;;  %1310 = vst.msk [vmem:[#allocation2 + $0x100] sm:$0xff] %vm1148_vm5, %v1214_v18 }
 0x245   : > { %v1218_v14 = vpop.permute.xlu1 %1217 }
 0x246   : > { %1312 = vst.msk [vmem:[#allocation2 + $0x110] sm:$0xff] %vm1148_vm5, %v1218_v14  ;;  %v1222_v19 = vpop.permute.xlu0 %1221 }
 0x247   : > { %1314 = vst.msk [vmem:[#allocation2 + $0x120] sm:$0xff] %vm1148_vm5, %v1222_v19 }
 0x249   : > { %v1224_v20 = vpop.permute.xlu1 %1223 }
 0x24a   : > { %1315 = vst.msk [vmem:[#allocation2 + $0x128] sm:$0xff] %vm1148_vm5, %v1224_v20  ;;  %v1226_v21 = vpop.permute.xlu0 %1225 }
 0x24b   : > { %1316 = vst.msk [vmem:[#allocation2 + $0x130] sm:$0xff] %vm1148_vm5, %v1226_v21 }
 0x24d   : > { %v1228_v22 = vpop.permute.xlu1 %1227 }
 0x24e   : > { %1317 = vst.msk [vmem:[#allocation2 + $0x138] sm:$0xff] %vm1148_vm5, %v1228_v22  ;;  %v1230_v23 = vpop.permute.xlu0 %1229 }
 0x24f   : > { %1318 = vst.msk [vmem:[#allocation2 + $0x140] sm:$0xff] %vm1148_vm5, %v1230_v23 }
 0x251   : > { %v1232_v24 = vpop.permute.xlu1 %1231 }
 0x252   : > { %1319 = vst.msk [vmem:[#allocation2 + $0x148] sm:$0xff] %vm1148_vm5, %v1232_v24  ;;  %v1234_v25 = vpop.permute.xlu0 %1233 }
 0x253   : > { %1320 = vst.msk [vmem:[#allocation2 + $0x150] sm:$0xff] %vm1148_vm5, %v1234_v25 }
 0x255   : > { %v1236_v26 = vpop.permute.xlu1 %1235 }
 0x256   : > { %1321 = vst.msk [vmem:[#allocation2 + $0x158] sm:$0xff] %vm1148_vm5, %v1236_v26  ;;  %v1238_v27 = vpop.permute.xlu0 %1237 }
 0x257   : > { %1322 = vst.msk [vmem:[#allocation2 + $0x160] sm:$0xff] %vm1148_vm5, %v1238_v27 }
 0x259   : > { %v1240_v28 = vpop.permute.xlu1 %1239 }
 0x25a   : > { %1323 = vst.msk [vmem:[#allocation2 + $0x168] sm:$0xff] %vm1148_vm5, %v1240_v28  ;;  %v1242_v29 = vpop.permute.xlu0 %1241 }
 0x25b   : > { %1324 = vst.msk [vmem:[#allocation2 + $0x170] sm:$0xff] %vm1148_vm5, %v1242_v29 }
 0x25d   : > { %v1244_v30 = vpop.permute.xlu1 %1243 }
 0x25e   : > { %1325 = vst.msk [vmem:[#allocation2 + $0x178] sm:$0xff] %vm1148_vm5, %v1244_v30  ;;  %v1246_v31 = vpop.permute.xlu0 %1245 }
 0x25f   : > { %1326 = vst.msk [vmem:[#allocation2 + $0x180] sm:$0xff] %vm1148_vm5, %v1246_v31 }
 0x261   : > { %v1248_v32 = vpop.permute.xlu1 %1247 }
 0x262   : > { %1327 = vst.msk [vmem:[#allocation2 + $0x188] sm:$0xff] %vm1148_vm5, %v1248_v32  ;;  %v1250_v33 = vpop.permute.xlu0 %1249 }
 0x263   : > { %1328 = vst.msk [vmem:[#allocation2 + $0x190] sm:$0xff] %vm1148_vm5, %v1250_v33 }
 0x265   : > { %v1252_v34 = vpop.permute.xlu1 %1251 }
 0x266   : > { %1329 = vst.msk [vmem:[#allocation2 + $0x198] sm:$0xff] %vm1148_vm5, %v1252_v34  ;;  %v1254_v35 = vpop.permute.xlu0 %1253 }
 0x267   : > { %1330 = vst.msk [vmem:[#allocation2 + $0x1a0] sm:$0xff] %vm1148_vm5, %v1254_v35 }
 0x269   : > { %v1256_v36 = vpop.permute.xlu1 %1255 }
 0x26a   : > { %1331 = vst.msk [vmem:[#allocation2 + $0x1a8] sm:$0xff] %vm1148_vm5, %v1256_v36  ;;  %v1258_v37 = vpop.permute.xlu0 %1257 }
 0x26b   : > { %1332 = vst.msk [vmem:[#allocation2 + $0x1b0] sm:$0xff] %vm1148_vm5, %v1258_v37 }
 0x26d   : > { %v1260_v38 = vpop.permute.xlu1 %1259 }
 0x26e   : > { %1333 = vst.msk [vmem:[#allocation2 + $0x1b8] sm:$0xff] %vm1148_vm5, %v1260_v38  ;;  %v1262_v39 = vpop.permute.xlu0 %1261 }
 0x26f   : > { %1334 = vst.msk [vmem:[#allocation2 + $0x1c0] sm:$0xff] %vm1148_vm5, %v1262_v39 }
 0x271   : > { %v1264_v40 = vpop.permute.xlu1 %1263 }
 0x272   : > { %1335 = vst.msk [vmem:[#allocation2 + $0x1c8] sm:$0xff] %vm1148_vm5, %v1264_v40  ;;  %v1266_v41 = vpop.permute.xlu0 %1265 }
 0x273   : > { %1336 = vst.msk [vmem:[#allocation2 + $0x1d0] sm:$0xff] %vm1148_vm5, %v1266_v41 }
 0x275   : > { %v1268_v42 = vpop.permute.xlu1 %1267 }
 0x276   : > { %1337 = vst.msk [vmem:[#allocation2 + $0x1d8] sm:$0xff] %vm1148_vm5, %v1268_v42  ;;  %v1270_v43 = vpop.permute.xlu0 %1269 }
 0x277   : > { %1338 = vst.msk [vmem:[#allocation2 + $0x1e0] sm:$0xff] %vm1148_vm5, %v1270_v43 }
 0x279   : > { %v1272_v45 = vpop.permute.xlu1 %1271 }
 0x27a   : > { %1339 = vst.msk [vmem:[#allocation2 + $0x1e8] sm:$0xff] %vm1148_vm5, %v1272_v45  ;;  %v1274_v46 = vpop.permute.xlu0 %1273 }
 0x27b   : > { %1340 = vst.msk [vmem:[#allocation2 + $0x1f0] sm:$0xff] %vm1148_vm5, %v1274_v46 }
 0x27d   : > { %v1276_v47 = vpop.permute.xlu1 %1275 }
 0x27e   : > { %1341 = vst.msk [vmem:[#allocation2 + $0x1f8] sm:$0xff] %vm1148_vm5, %v1276_v47 }
 0x27f PF: > { %v1406_v48 = vld [vmem:[%s3594_s6] sm:$0xff]  ;;  %v1407_v49 = vld [vmem:[%s3594_s6 + $0x8] sm:$0xff]  ;;  %vm1416_vm6 = vcmask 146432   ;;  %v1408_v53 = vld [vmem:[%s3594_s6 + $0x10] sm:$0x3]  ;;  %vm1513_vm7 = vcmask 1041408  }
 0x280   : > { %v2678_v50 = vpack.c.bf16 %v1407_v49, %v1406_v48  ;;  %v1374_v51 = vld [vmem:[%s2854_s18] sm:$0xff]  ;;  %v1375_v54 = vld [vmem:[%s2854_s18 + $0x8] sm:$0xff]  ;;  %v1376_v56 = vld [vmem:[%s2854_s18 + $0x10] sm:$0xff]  ;;  %vm2031_vm8 = vcmask 130048   ;;  %p2380_p6 = scmp.ne.s32.totalorder %s2764_s30, 1 }
 0x281   : > { %v1390_v52 = vld [vmem:[%s2854_s18 + $0x80] sm:$0xff]  ;;  %2612 = vmatprep.mubr.msk.f32.mxu0 %vm1416_vm6, %v1374_v51  ;;  %v1391_v55 = vld [vmem:[%s2854_s18 + $0x88] sm:$0xff]  ;;  %v1392_v57 = vld [vmem:[%s2854_s18 + $0x90] sm:$0xff]  ;;  %vm2169_vm9 = vcmask (!%p2380_p6), 122880  }
 0x282   : > { %2636 = vmatprep.mubr.msk.f32.mxu1 %vm1416_vm6, %v1390_v52  ;;  %2679 = vmatprep.subr.bf16.mxu0 %v2678_v50  ;;  %v1377_v58 = vld [vmem:[%s2854_s18 + $0x18] sm:$0xff]  ;;  %v1378_v60 = vld [vmem:[%s2854_s18 + $0x20] sm:$0xff]  ;;  %v1379_v62 = vld [vmem:[%s2854_s18 + $0x28] sm:$0xff] }
 0x283   : > { %2682 = vmatprep.subr.bf16.mxu1 %v2678_v50  ;;  %2681 = vmatpush3.bf16.msra.mxu0 %v2678_v50  ;;  %v1393_v59 = vld [vmem:[%s2854_s18 + $0x98] sm:$0xff]  ;;  %v1394_v61 = vld [vmem:[%s2854_s18 + $0xa0] sm:$0xff]  ;;  %v1395_v63 = vld [vmem:[%s2854_s18 + $0xa8] sm:$0xff] }
 0x284   : > { %2684 = vmatpush3.bf16.msra.mxu1 %v2678_v50  ;;  %2610 = vmatprep.subr.msk.mxu0 %vm1513_vm7, %v1408_v53  ;;  %v1380_v0 = vld [vmem:[%s2854_s18 + $0x30] sm:$0xff]  ;;  %v1381_v2 = vld [vmem:[%s2854_s18 + $0x38] sm:$0xff]  ;;  %v1382_v4 = vld [vmem:[%s2854_s18 + $0x40] sm:$0xff] }
 0x285   : > { %2683 = vmatprep.subr.msk.mxu1 %vm1513_vm7, %v1408_v53  ;;  %v1396_v1 = vld [vmem:[%s2854_s18 + $0xb0] sm:$0xff]  ;;  %v1397_v3 = vld [vmem:[%s2854_s18 + $0xb8] sm:$0xff]  ;;  %v1398_v5 = vld [vmem:[%s2854_s18 + $0xc0] sm:$0xff] }
 0x286   : > { %v1383_v6 = vld [vmem:[%s2854_s18 + $0x48] sm:$0xff]  ;;  %v1384_v8 = vld [vmem:[%s2854_s18 + $0x50] sm:$0xff]  ;;  %v1385_v10 = vld [vmem:[%s2854_s18 + $0x58] sm:$0xff] }
 0x287   : > { %2611 = vmatpush3.msk.msra.mxu0 %vm1513_vm7, %v1408_v53  ;;  %v1399_v7 = vld [vmem:[%s2854_s18 + $0xc8] sm:$0xff]  ;;  %v1400_v9 = vld [vmem:[%s2854_s18 + $0xd0] sm:$0xff]  ;;  %v1401_v11 = vld [vmem:[%s2854_s18 + $0xd8] sm:$0xff] }
 0x288   : > { %2685 = vmatpush3.msk.msra.mxu1 %vm1513_vm7, %v1408_v53  ;;  %2613 = vmatmul.mubr.msk.f32.vlgmr.msra.gmra.mrb[0].mxu0 %vm1416_vm6, %v1375_v54  ;;  %v1386_v12 = vld [vmem:[%s2854_s18 + $0x60] sm:$0xff]  ;;  %v1387_v15 = vld [vmem:[%s2854_s18 + $0x68] sm:$0xff]  ;;  %v1388_v44 = vld [vmem:[%s2854_s18 + $0x70] sm:$0xff] }
 0x289   : > { %2637 = vmatmul.mubr.msk.f32.vlgmr.msra.gmra.mrb[0].mxu1 %vm1416_vm6, %v1391_v55  ;;  %2615 = vmatprep.mubr.msk.f32.mxu0 %vm1416_vm6, %v1376_v56  ;;  %v1402_v13 = vld [vmem:[%s2854_s18 + $0xe0] sm:$0xff]  ;;  %v1403_v16 = vld [vmem:[%s2854_s18 + $0xe8] sm:$0xff]  ;;  %v1404_v17 = vld [vmem:[%s2854_s18 + $0xf0] sm:$0xff] }
 0x28a   : > { %2639 = vmatprep.mubr.msk.f32.mxu1 %vm1416_vm6, %v1392_v57  ;;  %v1389_v18 = vld [vmem:[%s2854_s18 + $0x78] sm:$0xff]  ;;  %v1743_v19 = vld [vmem:[%s2859_s21 + $0x8] sm:$0xff]  ;;  %v1742_v23 = vld [vmem:[%s2859_s21] sm:$0xff] }
 0x28b   : > { %v1405_v14 = vld [vmem:[%s2854_s18 + $0xf8] sm:$0xff]  ;;  %v1775_v20 = vld [vmem:[#allocation2 + $0x8] sm:$0xff]  ;;  %v1774_v24 = vld [vmem:[#allocation2] sm:$0xff] }
 0x28c   : > { %2616 = vmatmul.mubr.msk.f32.gmra.mrb[2].mxu0 %vm1416_vm6, %v1377_v58  ;;  %v1759_v21 = vld [vmem:[%s2859_s21 + $0x88] sm:$0xff]  ;;  %v1758_v25 = vld [vmem:[%s2859_s21 + $0x80] sm:$0xff]  ;;  %v1745_v27 = vld [vmem:[%s2859_s21 + $0x18] sm:$0xff]  ;;  %v1807_v41 = vmul.f32 %v1775_v20, %v1743_v19  ;;  %v1806_v50 = vmul.f32 %v1774_v24, %v1742_v23 }
 0x28d   : > { %2640 = vmatmul.mubr.msk.f32.gmra.mrb[2].mxu1 %vm1416_vm6, %v1393_v59  ;;  %2618 = vmatprep.mubr.msk.f32.mxu0 %vm1416_vm6, %v1378_v60  ;;  %v1791_v22 = vld [vmem:[#allocation2 + $0x88] sm:$0xff]  ;;  %v1790_v26 = vld [vmem:[#allocation2 + $0x80] sm:$0xff]  ;;  %v1777_v28 = vld [vmem:[#allocation2 + $0x18] sm:$0xff] }
 0x28e   : > { %2642 = vmatprep.mubr.msk.f32.mxu1 %vm1416_vm6, %v1394_v61  ;;  %v1761_v29 = vld [vmem:[%s2859_s21 + $0x98] sm:$0xff]  ;;  %v1744_v31 = vld [vmem:[%s2859_s21 + $0x10] sm:$0xff]  ;;  %v1840_v35 = vld [vmem:[#allocation2 + $0x108] sm:$0xff]  ;;  %v1823_v42 = vmul.f32 %v1791_v22, %v1759_v21  ;;  %v1822_v51 = vmul.f32 %v1790_v26, %v1758_v25  ;;  %v1809_v58 = vmul.f32 %v1777_v28, %v1745_v27 }
 0x28f   : > { %v1793_v30 = vld [vmem:[#allocation2 + $0x98] sm:$0xff]  ;;  %v1776_v32 = vld [vmem:[#allocation2 + $0x10] sm:$0xff]  ;;  %v1856_v36 = vld [vmem:[#allocation2 + $0x188] sm:$0xff] }
 0x290   : > { %2619 = vmatmul.mubr.msk.f32.gmra.mrb[4].mxu0 %vm1416_vm6, %v1379_v62  ;;  %v1760_v33 = vld [vmem:[%s2859_s21 + $0x90] sm:$0xff]  ;;  %v1747_v37 = vld [vmem:[%s2859_s21 + $0x28] sm:$0xff]  ;;  %v1839_v43 = vld [vmem:[#allocation2 + $0x100] sm:$0xff]  ;;  %v1825_v59 = vmul.f32 %v1793_v30, %v1761_v29 }
 0x291   : > { %2643 = vmatmul.mubr.msk.f32.gmra.mrb[4].mxu1 %vm1416_vm6, %v1395_v63  ;;  %2621 = vmatprep.mubr.msk.f32.mxu0 %vm1416_vm6, %v1380_v0  ;;  %v1792_v34 = vld [vmem:[#allocation2 + $0x90] sm:$0xff]  ;;  %v1779_v38 = vld [vmem:[#allocation2 + $0x28] sm:$0xff]  ;;  %v1855_v45 = vld [vmem:[#allocation2 + $0x180] sm:$0xff]  ;;  %v3345_v19 = vadd.f32 %v1839_v43, %v1806_v50 }
 0x292   : > { %2645 = vmatprep.mubr.msk.f32.mxu1 %vm1416_vm6, %v1396_v1  ;;  %v1763_v39 = vld [vmem:[%s2859_s21 + $0xa8] sm:$0xff]  ;;  %v1746_v46 = vld [vmem:[%s2859_s21 + $0x20] sm:$0xff]  ;;  %v1842_v52 = vld [vmem:[#allocation2 + $0x118] sm:$0xff]  ;;  %v3347_v20 = vadd.f32 %v1855_v45, %v1822_v51 }
 0x293   : > { %v1795_v40 = vld [vmem:[#allocation2 + $0xa8] sm:$0xff]  ;;  %v1778_v47 = vld [vmem:[#allocation2 + $0x20] sm:$0xff]  ;;  %v1858_v53 = vld [vmem:[#allocation2 + $0x198] sm:$0xff]  ;;  %v3351_v28 = vadd.f32 %v1842_v52, %v1809_v58 }
 0x294   : > { %2622 = vmatmul.mubr.msk.f32.gmra.mrb[6].mxu0 %vm1416_vm6, %v1381_v2  ;;  %v1762_v48 = vld [vmem:[%s2859_s21 + $0xa0] sm:$0xff]  ;;  %v1749_v54 = vld [vmem:[%s2859_s21 + $0x38] sm:$0xff]  ;;  %v1841_v60 = vld [vmem:[#allocation2 + $0x110] sm:$0xff]  ;;  %v1808_v2 = vmul.f32 %v1776_v32, %v1744_v31  ;;  %v1810_v21 = vmul.f32 %v1778_v47, %v1746_v46  ;;  %v3353_v29 = vadd.f32 %v1858_v53, %v1825_v59 }
 0x295   : > { %2646 = vmatmul.mubr.msk.f32.gmra.mrb[6].mxu1 %vm1416_vm6, %v1397_v3  ;;  %2624 = vmatprep.mubr.msk.f32.mxu0 %vm1416_vm6, %v1382_v4  ;;  %v1794_v49 = vld [vmem:[#allocation2 + $0xa0] sm:$0xff]  ;;  %v1781_v55 = vld [vmem:[#allocation2 + $0x38] sm:$0xff]  ;;  %v1857_v61 = vld [vmem:[#allocation2 + $0x190] sm:$0xff]  ;;  %v1824_v3 = vmul.f32 %v1792_v34, %v1760_v33 }
 0x296   : > { %2648 = vmatprep.mubr.msk.f32.mxu1 %vm1416_vm6, %v1398_v5  ;;  %v1765_v56 = vld [vmem:[%s2859_s21 + $0xb8] sm:$0xff]  ;;  %v1748_v62 = vld [vmem:[%s2859_s21 + $0x30] sm:$0xff]  ;;  %v1844_v4 = vld [vmem:[#allocation2 + $0x128] sm:$0xff]  ;;  %v1826_v22 = vmul.f32 %v1794_v49, %v1762_v48  ;;  %v1813_v30 = vmul.f32 %v1781_v55, %v1749_v54 }
 0x297   : > { %v1797_v57 = vld [vmem:[#allocation2 + $0xb8] sm:$0xff]  ;;  %v1780_v63 = vld [vmem:[#allocation2 + $0x30] sm:$0xff]  ;;  %v1860_v5 = vld [vmem:[#allocation2 + $0x1a8] sm:$0xff] }
 0x298   : > { %2625 = vmatmul.mubr.msk.f32.gmra.mrb[8].mxu0 %vm1416_vm6, %v1383_v6  ;;  %v1764_v0 = vld [vmem:[%s2859_s21 + $0xb0] sm:$0xff]  ;;  %v1751_v6 = vld [vmem:[%s2859_s21 + $0x48] sm:$0xff]  ;;  %v1846_v23 = vld [vmem:[#allocation2 + $0x138] sm:$0xff]  ;;  %v1829_v31 = vmul.f32 %v1797_v57, %v1765_v56 }
 0x299   : > { %2649 = vmatmul.mubr.msk.f32.gmra.mrb[8].mxu1 %vm1416_vm6, %v1399_v7  ;;  %2627 = vmatprep.mubr.msk.f32.mxu0 %vm1416_vm6, %v1384_v8  ;;  %v1796_v1 = vld [vmem:[#allocation2 + $0xb0] sm:$0xff]  ;;  %v1783_v7 = vld [vmem:[#allocation2 + $0x48] sm:$0xff]  ;;  %v1862_v24 = vld [vmem:[#allocation2 + $0x1b8] sm:$0xff] }
 0x29a   : > { %2651 = vmatprep.mubr.msk.f32.mxu1 %vm1416_vm6, %v1400_v9  ;;  %v1767_v8 = vld [vmem:[%s2859_s21 + $0xc8] sm:$0xff]  ;;  %v1753_v25 = vld [vmem:[%s2859_s21 + $0x58] sm:$0xff]  ;;  %v1845_v32 = vld [vmem:[#allocation2 + $0x130] sm:$0xff]  ;;  %v1815_v49 = vmul.f32 %v1783_v7, %v1751_v6 }
 0x29b   : > { %v1799_v9 = vld [vmem:[#allocation2 + $0xc8] sm:$0xff]  ;;  %v1785_v26 = vld [vmem:[#allocation2 + $0x58] sm:$0xff]  ;;  %v1861_v33 = vld [vmem:[#allocation2 + $0x1b0] sm:$0xff] }
 0x29c   : > { %2628 = vmatmul.mubr.msk.f32.gmra.mrb[10].mxu0 %vm1416_vm6, %v1385_v10  ;;  %v3339_v10 = vadd.f32 %v1840_v35, %v1807_v41  ;;  %v1769_v27 = vld [vmem:[%s2859_s21 + $0xd8] sm:$0xff]  ;;  %v1752_v35 = vld [vmem:[%s2859_s21 + $0x50] sm:$0xff]  ;;  %v1848_v41 = vld [vmem:[#allocation2 + $0x148] sm:$0xff]  ;;  %v1831_v50 = vmul.f32 %v1799_v9, %v1767_v8 }
 0x29d   : > { %2652 = vmatmul.mubr.msk.f32.gmra.mrb[10].mxu1 %vm1416_vm6, %v1401_v11  ;;  %2630 = vmatprep.mubr.msk.f32.mxu0 %vm1416_vm6, %v1386_v12  ;;  %v3341_v11 = vadd.f32 %v1856_v36, %v1823_v42  ;;  %v1811_v12 = vmul.f32 %v1779_v38, %v1747_v37  ;;  %v1801_v34 = vld [vmem:[#allocation2 + $0xd8] sm:$0xff]  ;;  %v1784_v36 = vld [vmem:[#allocation2 + $0x50] sm:$0xff]  ;;  %v3356_v37 = vadd.f32 %v1841_v60, %v1808_v2  ;;  %v1864_v42 = vld [vmem:[#allocation2 + $0x1c8] sm:$0xff] }
 0x29e   : > { %2654 = vmatprep.mubr.msk.f32.mxu1 %vm1416_vm6, %v1402_v13  ;;  %v1827_v13 = vmul.f32 %v1795_v40, %v1763_v39  ;;  %v3358_v38 = vadd.f32 %v1857_v61, %v1824_v3  ;;  %v1812_v39 = vmul.f32 %v1780_v63, %v1748_v62  ;;  %v1828_v40 = vmul.f32 %v1796_v1, %v1764_v0  ;;  %v1768_v43 = vld [vmem:[%s2859_s21 + $0xd0] sm:$0xff]  ;;  %v1755_v46 = vld [vmem:[%s2859_s21 + $0x68] sm:$0xff]  ;;  %v1847_v51 = vld [vmem:[#allocation2 + $0x140] sm:$0xff] }
 0x29f   : > { %v1800_v45 = vld [vmem:[#allocation2 + $0xd0] sm:$0xff]  ;;  %v3362_v47 = vadd.f32 %v1844_v4, %v1811_v12  ;;  %v1863_v52 = vld [vmem:[#allocation2 + $0x1c0] sm:$0xff]  ;;  %v1787_v53 = vld [vmem:[#allocation2 + $0x68] sm:$0xff]  ;;  %v3373_v1 = vadd.f32 %v1846_v23, %v1813_v30  ;;  %v3375_v2 = vadd.f32 %v1862_v24, %v1829_v31  ;;  %v1817_v3 = vmul.f32 %v1785_v26, %v1753_v25 }
 0x2a0   : > { %2631 = vmatmul.mubr.msk.f32.gmra.mrb[12].mxu0 %vm1416_vm6, %v1387_v15  ;;  %v1843_v15 = vld [vmem:[#allocation2 + $0x120] sm:$0xff]  ;;  %v3364_v48 = vadd.f32 %v1860_v5, %v1827_v13  ;;  %v1771_v54 = vld [vmem:[%s2859_s21 + $0xe8] sm:$0xff]  ;;  %v1850_v60 = vld [vmem:[#allocation2 + $0x158] sm:$0xff]  ;;  %v1833_v4 = vmul.f32 %v1801_v34, %v1769_v27  ;;  %v3378_v12 = vadd.f32 %v1845_v32, %v1812_v39  ;;  %v3380_v13 = vadd.f32 %v1861_v33, %v1828_v40 }
 0x2a1   : > { %2655 = vmatmul.mubr.msk.f32.gmra.mrb[12].mxu1 %vm1416_vm6, %v1403_v16  ;;  %2633 = vmatprep.mubr.msk.f32.mxu0 %vm1416_vm6, %v1388_v44  ;;  %v1859_v16 = vld [vmem:[#allocation2 + $0x1a0] sm:$0xff]  ;;  %v1803_v55 = vld [vmem:[#allocation2 + $0xe8] sm:$0xff]  ;;  %v3367_v56 = vadd.f32 %v1843_v15, %v1810_v21  ;;  %v1866_v61 = vld [vmem:[#allocation2 + $0x1d8] sm:$0xff]  ;;  %v1816_v15 = vmul.f32 %v1784_v36, %v1752_v35  ;;  %v3386_v21 = vadd.f32 %v1864_v42, %v1831_v50 }
 0x2a2   : > { %2657 = vmatprep.mubr.msk.f32.mxu1 %vm1416_vm6, %v1404_v17  ;;  %v1750_v44 = vld [vmem:[%s2859_s21 + $0x40] sm:$0xff]  ;;  %v3369_v57 = vadd.f32 %v1859_v16, %v1826_v22  ;;  %v1849_v5 = vld [vmem:[#allocation2 + $0x150] sm:$0xff]  ;;  %v1757_v8 = vld [vmem:[%s2859_s21 + $0x78] sm:$0xff]  ;;  %v1832_v16 = vmul.f32 %v1800_v45, %v1768_v43  ;;  %v1819_v22 = vmul.f32 %v1787_v53, %v1755_v46  ;;  %v1835_v23 = vmul.f32 %v1803_v55, %v1771_v54 }
 0x2a3   : > { %v1782_v17 = vld [vmem:[#allocation2 + $0x40] sm:$0xff]  ;;  %v1865_v6 = vld [vmem:[#allocation2 + $0x1d0] sm:$0xff]  ;;  %v1789_v9 = vld [vmem:[#allocation2 + $0x78] sm:$0xff]  ;;  %v3398_v36 = vadd.f32 %v1850_v60, %v1817_v3  ;;  %v3400_v39 = vadd.f32 %v1866_v61, %v1833_v4 }
 0x2a4   : > { %2634 = vmatmul.mubr.msk.f32.gmra.mrb[14].mxu0 %vm1416_vm6, %v1389_v18  ;;  %v1766_v18 = vld [vmem:[%s2859_s21 + $0xc0] sm:$0xff]  ;;  %v1814_v58 = vmul.f32 %v1782_v17, %v1750_v44  ;;  %v1773_v44 = vld [vmem:[%s2859_s21 + $0xf8] sm:$0xff]  ;;  %v1788_v24 = vld [vmem:[#allocation2 + $0x70] sm:$0xff]  ;;  %v1821_v42 = vmul.f32 %v1789_v9, %v1757_v8  ;;  %v3404_v50 = vadd.f32 %v1865_v6, %v1832_v16 }
 0x2a5   : > { %2658 = vmatmul.mubr.msk.f32.gmra.mrb[14].mxu1 %vm1416_vm6, %v1405_v14  ;;  %v1798_v14 = vld [vmem:[#allocation2 + $0xc0] sm:$0xff]  ;;  %v1805_v17 = vld [vmem:[#allocation2 + $0xf8] sm:$0xff]  ;;  %v1772_v25 = vld [vmem:[%s2859_s21 + $0xf0] sm:$0xff] }
 0x2a6   : > { %v1830_v59 = vmul.f32 %v1798_v14, %v1766_v18  ;;  %v1754_v62 = vld [vmem:[%s2859_s21 + $0x60] sm:$0xff]  ;;  %v1756_v18 = vld [vmem:[%s2859_s21 + $0x70] sm:$0xff]  ;;  %v3384_v14 = vadd.f32 %v1848_v41, %v1815_v49  ;;  %v3394_v30 = vadd.f32 %v1847_v51, %v1814_v58  ;;  %v1852_v32 = vld [vmem:[#allocation2 + $0x168] sm:$0xff]  ;;  %v1837_v43 = vmul.f32 %v1805_v17, %v1773_v44 }
 0x2a7   : > { %v1786_v63 = vld [vmem:[#allocation2 + $0x60] sm:$0xff]  ;;  %v1804_v26 = vld [vmem:[#allocation2 + $0xf0] sm:$0xff]  ;;  %v1868_v33 = vld [vmem:[#allocation2 + $0x1e8] sm:$0xff]  ;;  %v3402_v49 = vadd.f32 %v1849_v5, %v1816_v15  ;;  %v1820_v53 = vmul.f32 %v1788_v24, %v1756_v18  ;;  %v3408_v61 = vadd.f32 %v1852_v32, %v1819_v22 }
 0x2a8   : > { %v1770_v0 = vld [vmem:[%s2859_s21 + $0xe0] sm:$0xff]  ;;  %v3396_v31 = vadd.f32 %v1863_v52, %v1830_v59  ;;  %v1818_v34 = vmul.f32 %v1786_v63, %v1754_v62  ;;  %v1854_v51 = vld [vmem:[#allocation2 + $0x178] sm:$0xff]  ;;  %v1836_v54 = vmul.f32 %v1804_v26, %v1772_v25  ;;  %v3410_v62 = vadd.f32 %v1868_v33, %v1835_v23  ;;  %v1853_v63 = vld [vmem:[#allocation2 + $0x170] sm:$0xff] }
 0x2a9   : > { %v1802_v7 = vld [vmem:[#allocation2 + $0xe0] sm:$0xff]  ;;  %v1870_v52 = vld [vmem:[#allocation2 + $0x1f8] sm:$0xff]  ;;  %v3420_v9 = vadd.f32 %v1854_v51, %v1821_v42  ;;  %v1936_v16 = vld [vmem:[#allocation3 + $0x8] sm:$0xff]  ;;  %v3426_v24 = vadd.f32 %v1853_v63, %v1820_v53 }
 0x2aa   : > { %v3392_v27 = vld [vmem:[%s3595_s7] ss:$0 sm:$0xff]  ;;  %v1834_v35 = vmul.f32 %v1802_v7, %v1770_v0  ;;  %v1869_v0 = vld [vmem:[#allocation2 + $0x1f0] sm:$0xff]  ;;  %v3422_v15 = vadd.f32 %v1870_v52, %v1837_v43  ;;  %v1952_v44 = vld [vmem:[#allocation3 + $0x88] sm:$0xff] }
 0x2ab   : > { %v1851_v40 = vld [vmem:[#allocation2 + $0x160] sm:$0xff]  ;;  %v3428_v25 = vadd.f32 %v1869_v0, %v1836_v54  ;;  %v1938_v54 = vld [vmem:[#allocation3 + $0x18] sm:$0xff] }
 0x2ac   : > { %v1867_v41 = vld [vmem:[#allocation2 + $0x1e0] sm:$0xff]  ;;  %v3414_v5 = vadd.f32 %v1851_v40, %v1818_v34 }
 0x2ad   : > { %v3416_v6 = vadd.f32 %v1867_v41, %v1834_v35  ;;  %v1935_v32 = vld [vmem:[#allocation3] sm:$0xff] }
 0x35b   : > { %v2614_v45 = vpop.f32.mrb[0].mxu0 }
 0x35c   : > { %v2638_v46 = vpop.f32.mrb[0].mxu1  ;;  %v1589_v55 = vadd.f32 %v2614_v45, %v3392_v27  ;;  %v1583_v59 = vpop.f32.mrb[1].mxu0 }
 0x35d   : > { %v1669_v58 = vadd.f32 %v2638_v46, %v3392_v27  ;;  %v1663_v60 = vpop.f32.mrb[1].mxu1  ;;  %v1584_v3 = vadd.f32 %v3392_v27, %v1583_v59 }
 0x35e   : > { %v1664_v4 = vadd.f32 %v3392_v27, %v1663_v60  ;;  %v1904_v7 = vsub.f32 %v1589_v55, %v3339_v10  ;;  %v1954_v55 = vld [vmem:[#allocation3 + $0x98] sm:$0xff] }
 0x35f   : > { %v1920_v8 = vsub.f32 %v1669_v58, %v3341_v11  ;;  %v1903_v17 = vsub.f32 %v1584_v3, %v3345_v19  ;;  %v2617_v22 = vpop.f32.mrb[2].mxu0  ;;  %v1951_v11 = vld [vmem:[#allocation3 + $0x80] sm:$0xff] }
 0x360   : > { %v1919_v18 = vsub.f32 %v1664_v4, %v3347_v20  ;;  %v2641_v23 = vpop.f32.mrb[2].mxu1  ;;  %v1968_v26 = vmul.f32 %v1904_v7, %v1904_v7  ;;  %v1599_v33 = vadd.f32 %v2617_v22, %v3392_v27  ;;  %v1593_v35 = vpop.f32.mrb[3].mxu0  ;;  %v1937_v4 = vld [vmem:[#allocation3 + $0x10] sm:$0xff] }
 0x361   : > { %v1984_v10 = vmul.f32 %v1920_v8, %v1920_v8  ;;  %v1679_v34 = vadd.f32 %v2641_v23, %v3392_v27  ;;  %v1673_v40 = vpop.f32.mrb[3].mxu1  ;;  %v1967_v41 = vmul.f32 %v1903_v17, %v1903_v17  ;;  %v1594_v20 = vadd.f32 %v3392_v27, %v1593_v35 }
 0x362   : > { %v1983_v19 = vmul.f32 %v1919_v18, %v1919_v18  ;;  %v1674_v42 = vadd.f32 %v3392_v27, %v1673_v40  ;;  %v2000_v43 = vadd.f32 %v1968_v26, %v1936_v16  ;;  %v1906_v46 = vsub.f32 %v1599_v33, %v3351_v28  ;;  %v1953_v28 = vld [vmem:[#allocation3 + $0x90] sm:$0xff]  ;;  %v1956_v33 = vld [vmem:[#allocation3 + $0xa8] sm:$0xff] }
 0x363   : > { %v2016_v45 = vadd.f32 %v1984_v10, %v1952_v44  ;;  %v1922_v51 = vsub.f32 %v1679_v34, %v3353_v29  ;;  %v1999_v52 = vadd.f32 %v1967_v41, %v1935_v32  ;;  %v1905_v58 = vsub.f32 %v1594_v20, %v3356_v37  ;;  %v2620_v60 = vpop.f32.mrb[4].mxu0 }
 0x364   : > { %v2015_v53 = vadd.f32 %v1983_v19, %v1951_v11  ;;  %v1921_v59 = vsub.f32 %v1674_v42, %v3358_v38  ;;  %v2644_v63 = vpop.f32.mrb[4].mxu1  ;;  %2033 = vst.msk [vmem:[#allocation3 + $0x8] sm:$0xff] %vm2031_vm8, %v2000_v43  ;;  %v1970_v0 = vmul.f32 %v1906_v46, %v1906_v46  ;;  %v1609_v29 = vadd.f32 %v2620_v60, %v3392_v27  ;;  %v1603_v8 = vpop.f32.mrb[5].mxu0  ;;  %v1940_v11 = vld [vmem:[#allocation3 + $0x28] sm:$0xff]  ;;  %v1939_v42 = vld [vmem:[#allocation3 + $0x20] sm:$0xff] }
 0x365   : > { %2049 = vst.msk [vmem:[#allocation3 + $0x88] sm:$0xff] %vm2031_vm8, %v2016_v45  ;;  %v1986_v3 = vmul.f32 %v1922_v51, %v1922_v51  ;;  %v1689_v7 = vadd.f32 %v2644_v63, %v3392_v27  ;;  %v1683_v16 = vpop.f32.mrb[5].mxu1  ;;  %2032 = vst.msk [vmem:[#allocation3] sm:$0xff] %vm2031_vm8, %v1999_v52  ;;  %v1969_v37 = vmul.f32 %v1905_v58, %v1905_v58  ;;  %v1942_v63 = vld [vmem:[#allocation3 + $0x38] sm:$0xff] }
 0x366   : > { %2048 = vst.msk [vmem:[#allocation3 + $0x80] sm:$0xff] %vm2031_vm8, %v2015_v53  ;;  %v1985_v38 = vmul.f32 %v1921_v59, %v1921_v59  ;;  %v1604_v44 = vadd.f32 %v3392_v27, %v1603_v8  ;;  %v1684_v17 = vadd.f32 %v3392_v27, %v1683_v16  ;;  %v2002_v18 = vadd.f32 %v1970_v0, %v1938_v54  ;;  %v1958_v0 = vld [vmem:[#allocation3 + $0xb8] sm:$0xff]  ;;  %v1941_v16 = vld [vmem:[#allocation3 + $0x30] sm:$0xff] }
 0x367   : > { %v2018_v22 = vadd.f32 %v1986_v3, %v1954_v55  ;;  %v1908_v23 = vsub.f32 %v1609_v29, %v3362_v47  ;;  %v1924_v26 = vsub.f32 %v1689_v7, %v3364_v48  ;;  %v2001_v10 = vadd.f32 %v1969_v37, %v1937_v4  ;;  %v2623_v40 = vpop.f32.mrb[6].mxu0  ;;  %v1955_v47 = vld [vmem:[#allocation3 + $0xa0] sm:$0xff] }
 0x368   : > { %v2017_v32 = vadd.f32 %v1985_v38, %v1953_v28  ;;  %v1907_v34 = vsub.f32 %v1604_v44, %v3367_v56  ;;  %v1923_v35 = vsub.f32 %v1684_v17, %v3369_v57  ;;  %v2647_v41 = vpop.f32.mrb[6].mxu1  ;;  %2035 = vst.msk [vmem:[#allocation3 + $0x18] sm:$0xff] %vm2031_vm8, %v2002_v18  ;;  %v1619_v48 = vadd.f32 %v2623_v40, %v3392_v27  ;;  %v1613_v45 = vpop.f32.mrb[7].mxu0 }
 0x369   : > { %2051 = vst.msk [vmem:[#allocation3 + $0x98] sm:$0xff] %vm2031_vm8, %v2018_v22  ;;  %v1972_v19 = vmul.f32 %v1908_v23, %v1908_v23  ;;  %v1988_v20 = vmul.f32 %v1924_v26, %v1924_v26  ;;  %v1699_v43 = vadd.f32 %v2647_v41, %v3392_v27  ;;  %v1693_v46 = vpop.f32.mrb[7].mxu1  ;;  %2034 = vst.msk [vmem:[#allocation3 + $0x10] sm:$0xff] %vm2031_vm8, %v2001_v10 }
 0x36a   : > { %2050 = vst.msk [vmem:[#allocation3 + $0x90] sm:$0xff] %vm2031_vm8, %v2017_v32  ;;  %v1971_v56 = vmul.f32 %v1907_v34, %v1907_v34  ;;  %v1987_v57 = vmul.f32 %v1923_v35, %v1923_v35  ;;  %v1614_v51 = vadd.f32 %v3392_v27, %v1613_v45  ;;  %v1694_v52 = vadd.f32 %v3392_v27, %v1693_v46  ;;  %v1960_v34 = vld [vmem:[#allocation3 + $0xc8] sm:$0xff] }
 0x36b   : > { %v2004_v53 = vadd.f32 %v1972_v19, %v1940_v11  ;;  %v2020_v54 = vadd.f32 %v1988_v20, %v1956_v33  ;;  %v1910_v55 = vsub.f32 %v1619_v48, %v3373_v1  ;;  %v1926_v58 = vsub.f32 %v1699_v43, %v3375_v2  ;;  %v2626_v28 = vpop.f32.mrb[8].mxu0  ;;  %v1957_v1 = vld [vmem:[#allocation3 + $0xb0] sm:$0xff]  ;;  %v1944_v33 = vld [vmem:[#allocation3 + $0x48] sm:$0xff] }
 0x36c   : > { %v2003_v59 = vadd.f32 %v1971_v56, %v1939_v42  ;;  %v2019_v60 = vadd.f32 %v1987_v57, %v1955_v47  ;;  %v1909_v3 = vsub.f32 %v1614_v51, %v3378_v12  ;;  %v1925_v4 = vsub.f32 %v1694_v52, %v3380_v13  ;;  %v2650_v29 = vpop.f32.mrb[8].mxu1  ;;  %v1623_v38 = vpop.f32.mrb[9].mxu0  ;;  %v1943_v47 = vld [vmem:[#allocation3 + $0x40] sm:$0xff] }
 0x36d   : > { %2037 = vst.msk [vmem:[#allocation3 + $0x28] sm:$0xff] %vm2031_vm8, %v2004_v53  ;;  %2053 = vst.msk [vmem:[#allocation3 + $0xa8] sm:$0xff] %vm2031_vm8, %v2020_v54  ;;  %v1974_v7 = vmul.f32 %v1910_v55, %v1910_v55  ;;  %v1990_v8 = vmul.f32 %v1926_v58, %v1926_v58  ;;  %v1629_v2 = vadd.f32 %v2626_v28, %v3392_v27  ;;  %v1703_v44 = vpop.f32.mrb[9].mxu1  ;;  %v1946_v58 = vld [vmem:[#allocation3 + $0x58] sm:$0xff] }
 0x36e   : > { %v1709_v37 = vadd.f32 %v2650_v29, %v3392_v27  ;;  %2036 = vst.msk [vmem:[#allocation3 + $0x20] sm:$0xff] %vm2031_vm8, %v2003_v59  ;;  %2052 = vst.msk [vmem:[#allocation3 + $0xa0] sm:$0xff] %vm2031_vm8, %v2019_v60  ;;  %v1973_v12 = vmul.f32 %v1909_v3, %v1909_v3  ;;  %v1989_v13 = vmul.f32 %v1925_v4, %v1925_v4  ;;  %v1962_v59 = vld [vmem:[#allocation3 + $0xd8] sm:$0xff]  ;;  %v1945_v29 = vld [vmem:[#allocation3 + $0x50] sm:$0xff] }
 0x36f   : > { %v1624_v17 = vadd.f32 %v3392_v27, %v1623_v38  ;;  %v1704_v18 = vadd.f32 %v3392_v27, %v1703_v44  ;;  %v2006_v22 = vadd.f32 %v1974_v7, %v1942_v63  ;;  %v2022_v23 = vadd.f32 %v1990_v8, %v1958_v0  ;;  %v2629_v41 = vpop.f32.mrb[10].mxu0 }
 0x370   : > { %v1912_v26 = vsub.f32 %v1629_v2, %v3384_v14  ;;  %v1928_v10 = vsub.f32 %v1709_v37, %v3386_v21  ;;  %v2005_v32 = vadd.f32 %v1973_v12, %v1941_v16  ;;  %v2021_v11 = vadd.f32 %v1989_v13, %v1957_v1  ;;  %v2653_v19 = vpop.f32.mrb[10].mxu1  ;;  %v1959_v14 = vld [vmem:[#allocation3 + $0xc0] sm:$0xff]  ;;  %v1633_v43 = vpop.f32.mrb[11].mxu0 }
 0x371   : > { %v1911_v35 = vsub.f32 %v1624_v17, %v3394_v30  ;;  %v1927_v40 = vsub.f32 %v1704_v18, %v3396_v31  ;;  %2039 = vst.msk [vmem:[#allocation3 + $0x38] sm:$0xff] %vm2031_vm8, %v2006_v22  ;;  %2055 = vst.msk [vmem:[#allocation3 + $0xb8] sm:$0xff] %vm2031_vm8, %v2022_v23  ;;  %v1639_v21 = vadd.f32 %v2629_v41, %v3392_v27  ;;  %v1713_v45 = vpop.f32.mrb[11].mxu1  ;;  %v1948_v18 = vld [vmem:[#allocation3 + $0x68] sm:$0xff] }
 0x372   : > { %v1976_v20 = vmul.f32 %v1912_v26, %v1912_v26  ;;  %v1992_v42 = vmul.f32 %v1928_v10, %v1928_v10  ;;  %v1719_v48 = vadd.f32 %v2653_v19, %v3392_v27  ;;  %2038 = vst.msk [vmem:[#allocation3 + $0x30] sm:$0xff] %vm2031_vm8, %v2005_v32  ;;  %2054 = vst.msk [vmem:[#allocation3 + $0xb0] sm:$0xff] %vm2031_vm8, %v2021_v11  ;;  %v1964_v22 = vld [vmem:[#allocation3 + $0xe8] sm:$0xff] }
 0x373   : > { %v1975_v30 = vmul.f32 %v1911_v35, %v1911_v35  ;;  %v1991_v31 = vmul.f32 %v1927_v40, %v1927_v40  ;;  %v1634_v46 = vadd.f32 %v3392_v27, %v1633_v43  ;;  %v1714_v56 = vadd.f32 %v3392_v27, %v1713_v45  ;;  %v2632_v0 = vpop.f32.mrb[12].mxu0  ;;  %v1950_v45 = vld [vmem:[#allocation3 + $0x78] sm:$0xff] }
 0x374   : > { %v2008_v57 = vadd.f32 %v1976_v20, %v1944_v33  ;;  %v2024_v51 = vadd.f32 %v1992_v42, %v1960_v34  ;;  %v1914_v52 = vsub.f32 %v1639_v21, %v3398_v36  ;;  %v1930_v53 = vsub.f32 %v1719_v48, %v3400_v39  ;;  %v2656_v3 = vpop.f32.mrb[12].mxu1  ;;  %v1961_v36 = vld [vmem:[#allocation3 + $0xd0] sm:$0xff]  ;;  %v1643_v8 = vpop.f32.mrb[13].mxu0  ;;  %v1947_v34 = vld [vmem:[#allocation3 + $0x60] sm:$0xff] }
 0x375   : > { %v2007_v54 = vadd.f32 %v1975_v30, %v1943_v47  ;;  %v2023_v55 = vadd.f32 %v1991_v31, %v1959_v14  ;;  %v1913_v60 = vsub.f32 %v1634_v46, %v3402_v49  ;;  %v1929_v63 = vsub.f32 %v1714_v56, %v3404_v50  ;;  %v1723_v16 = vpop.f32.mrb[13].mxu1  ;;  %v1966_v30 = vld [vmem:[#allocation3 + $0xf8] sm:$0xff] }
 0x376   : > { %2041 = vst.msk [vmem:[#allocation3 + $0x48] sm:$0xff] %vm2031_vm8, %v2008_v57  ;;  %2057 = vst.msk [vmem:[#allocation3 + $0xc8] sm:$0xff] %vm2031_vm8, %v2024_v51  ;;  %v1978_v4 = vmul.f32 %v1914_v52, %v1914_v52  ;;  %v1994_v28 = vmul.f32 %v1930_v53, %v1930_v53  ;;  %v1649_v39 = vadd.f32 %v2632_v0, %v3392_v27  ;;  %v1949_v57 = vld [vmem:[#allocation3 + $0x70] sm:$0xff] }
 0x377   : > { %v1729_v7 = vadd.f32 %v2656_v3, %v3392_v27  ;;  %2040 = vst.msk [vmem:[#allocation3 + $0x40] sm:$0xff] %vm2031_vm8, %v2007_v54  ;;  %2056 = vst.msk [vmem:[#allocation3 + $0xc0] sm:$0xff] %vm2031_vm8, %v2023_v55  ;;  %v1977_v49 = vmul.f32 %v1913_v60, %v1913_v60  ;;  %v1993_v50 = vmul.f32 %v1929_v63, %v1929_v63  ;;  %v2635_v10 = vpop.f32.mrb[14].mxu0  ;;  %v1965_v51 = vld [vmem:[#allocation3 + $0xf0] sm:$0xff]  ;;  %v2069_v55 = vld [vmem:[#allocation3 + $0x8] sm:$0xff] (!%p2380_p6) }
 0x378   : > { %v1644_v1 = vadd.f32 %v3392_v27, %v1643_v8  ;;  %v1724_v2 = vadd.f32 %v3392_v27, %v1723_v16  ;;  %v2010_v37 = vadd.f32 %v1978_v4, %v1946_v58  ;;  %v2026_v38 = vadd.f32 %v1994_v28, %v1962_v59  ;;  %v2659_v32 = vpop.f32.mrb[14].mxu1  ;;  %v1653_v40 = vpop.f32.mrb[15].mxu0  ;;  %v2070_v58 = vld [vmem:[#allocation3 + $0x10] sm:$0xff] (!%p2380_p6)  ;;  %v2071_v59 = vld [vmem:[#allocation3 + $0x18] sm:$0xff] (!%p2380_p6)  ;;  %v2072_v3 = vld [vmem:[#allocation3 + $0x20] sm:$0xff] (!%p2380_p6) }
 0x379   : > { %v1916_v44 = vsub.f32 %v1649_v39, %v3408_v61  ;;  %v1932_v12 = vsub.f32 %v1729_v7, %v3410_v62  ;;  %v2009_v13 = vadd.f32 %v1977_v49, %v1945_v29  ;;  %v2025_v17 = vadd.f32 %v1993_v50, %v1961_v36  ;;  %v1963_v61 = vld [vmem:[#allocation3 + $0xe0] sm:$0xff]  ;;  %v1733_v41 = vpop.f32.mrb[15].mxu1  ;;  %v2073_v29 = vld [vmem:[#allocation3 + $0x28] sm:$0xff] (!%p2380_p6)  ;;  %v2074_v7 = vld [vmem:[#allocation3 + $0x30] sm:$0xff] (!%p2380_p6) }
 0x37a   : > { %v1915_v23 = vsub.f32 %v1644_v1, %v3414_v5  ;;  %v1931_v26 = vsub.f32 %v1724_v2, %v3416_v6  ;;  %2043 = vst.msk [vmem:[#allocation3 + $0x58] sm:$0xff] %vm2031_vm8, %v2010_v37  ;;  %2059 = vst.msk [vmem:[#allocation3 + $0xd8] sm:$0xff] %vm2031_vm8, %v2026_v38  ;;  %v1659_v62 = vadd.f32 %v2635_v10, %v3392_v27  ;;  %v2101_v63 = vsel (!%p2380_p6), %vm2031_vm8, %v2069_v55, 0.0  ;;  %v2075_v49 = vld [vmem:[#allocation3 + $0x38] sm:$0xff] (!%p2380_p6) }
 0x37b   : > { %v1980_v11 = vmul.f32 %v1916_v44, %v1916_v44  ;;  %v1996_v33 = vmul.f32 %v1932_v12, %v1932_v12  ;;  %v1739_v35 = vadd.f32 %v2659_v32, %v3392_v27  ;;  %2042 = vst.msk [vmem:[#allocation3 + $0x50] sm:$0xff] %vm2031_vm8, %v2009_v13  ;;  %2058 = vst.msk [vmem:[#allocation3 + $0xd0] sm:$0xff] %vm2031_vm8, %v2025_v17  ;;  %v2103_v0 = vsel (!%p2380_p6), %vm2031_vm8, %v2070_v58, 0.0 }
 0x37c   : > { %v1979_v5 = vmul.f32 %v1915_v23, %v1915_v23  ;;  %v1995_v6 = vmul.f32 %v1931_v26, %v1931_v26  ;;  %v1654_v19 = vadd.f32 %v3392_v27, %v1653_v40  ;;  %v1734_v20 = vadd.f32 %v3392_v27, %v1733_v41 }
 0x37d   : > { %v2012_v42 = vadd.f32 %v1980_v11, %v1948_v18  ;;  %v2028_v47 = vadd.f32 %v1996_v33, %v1964_v22  ;;  %v1918_v14 = vsub.f32 %v1659_v62, %v3420_v9  ;;  %v1934_v21 = vsub.f32 %v1739_v35, %v3422_v15  ;;  %v2077_v44 = vld [vmem:[#allocation3 + $0x48] sm:$0xff] (!%p2380_p6) }
 0x37e   : > { %v2011_v48 = vadd.f32 %v1979_v5, %v1947_v34  ;;  %v2027_v43 = vadd.f32 %v1995_v6, %v1963_v61  ;;  %v1917_v31 = vsub.f32 %v1654_v19, %v3426_v24  ;;  %v1933_v46 = vsub.f32 %v1734_v20, %v3428_v25  ;;  %2067 = sbr.rel (%p2380_p6) target bundleno = 971 (0x3cb), region = 64  ;;  %v2068_v25 = vld [vmem:[#allocation3] sm:$0xff] (!%p2380_p6) }
 0x37f   : > { %2045 = vst.msk [vmem:[#allocation3 + $0x68] sm:$0xff] %vm2031_vm8, %v2012_v42  ;;  %2061 = vst.msk [vmem:[#allocation3 + $0xe8] sm:$0xff] %vm2031_vm8, %v2028_v47  ;;  %v1982_v56 = vmul.f32 %v1918_v14, %v1918_v14  ;;  %v1998_v27 = vmul.f32 %v1934_v21, %v1934_v21  ;;  %v2100_v60 = vsel (!%p2380_p6), %vm2031_vm8, %v2068_v25, 0.0  ;;  %v2105_v28 = vsel (!%p2380_p6), %vm2031_vm8, %v2071_v59, 0.0  ;;  %v2076_v2 = vld [vmem:[#allocation3 + $0x40] sm:$0xff] (!%p2380_p6)  ;;  %v2085_v14 = vld [vmem:[#allocation3 + $0x88] sm:$0xff] (!%p2380_p6) }
 0x380   : > { %2044 = vst.msk [vmem:[#allocation3 + $0x60] sm:$0xff] %vm2031_vm8, %v2011_v48  ;;  %2060 = vst.msk [vmem:[#allocation3 + $0xe0] sm:$0xff] %vm2031_vm8, %v2027_v43  ;;  %v1981_v9 = vmul.f32 %v1917_v31, %v1917_v31  ;;  %v1997_v15 = vmul.f32 %v1933_v46, %v1933_v46  ;;  %v2102_v4 = vadd.f32 (!%p2380_p6), %v2101_v63, %v2100_v60  ;;  %v2107_v39 = vsel (!%p2380_p6), %vm2031_vm8, %v2072_v3, 0.0  ;;  %v2084_v20 = vld [vmem:[#allocation3 + $0x80] sm:$0xff] (!%p2380_p6)  ;;  %v2086_v43 = vld [vmem:[#allocation3 + $0x90] sm:$0xff] (!%p2380_p6) }
 0x381   : > { %v2014_v52 = vadd.f32 %v1982_v56, %v1950_v45  ;;  %v2030_v53 = vadd.f32 %v1998_v27, %v1966_v30  ;;  %v2109_v16 = vsel (!%p2380_p6), %vm2031_vm8, %v2073_v29, 0.0  ;;  %v2111_v1 = vsel (!%p2380_p6), %vm2031_vm8, %v2074_v7, 0.0  ;;  %v2079_v23 = vld [vmem:[#allocation3 + $0x58] sm:$0xff] (!%p2380_p6)  ;;  %v2088_v27 = vld [vmem:[#allocation3 + $0xa0] sm:$0xff] (!%p2380_p6) }
 0x382   : > { %v2013_v54 = vadd.f32 %v1981_v9, %v1949_v57  ;;  %v2029_v24 = vadd.f32 %v1997_v15, %v1965_v51  ;;  %v2104_v36 = vadd.f32 (!%p2380_p6), %v2103_v0, %v2102_v4  ;;  %v2113_v38 = vsel (!%p2380_p6), %vm2031_vm8, %v2075_v49, 0.0  ;;  %v2078_v17 = vld [vmem:[#allocation3 + $0x50] sm:$0xff] (!%p2380_p6)  ;;  %v2087_v31 = vld [vmem:[#allocation3 + $0x98] sm:$0xff] (!%p2380_p6)  ;;  %v2089_v9 = vld [vmem:[#allocation3 + $0xa8] sm:$0xff] (!%p2380_p6) }
 0x383   : > { %2047 = vst.msk [vmem:[#allocation3 + $0x78] sm:$0xff] %vm2031_vm8, %v2014_v52  ;;  %2063 = vst.msk [vmem:[#allocation3 + $0xf8] sm:$0xff] %vm2031_vm8, %v2030_v53  ;;  %v2115_v13 = vsel (!%p2380_p6), %vm2031_vm8, %v2076_v2, 0.0  ;;  %v2117_v22 = vsel (!%p2380_p6), %vm2031_vm8, %v2077_v44, 0.0  ;;  %v2119_v10 = vsel (!%p2380_p6), %vm2031_vm8, %v2078_v17, 0.0  ;;  %v2121_v33 = vsel (!%p2380_p6), %vm2031_vm8, %v2079_v23, 0.0 }
 0x384   : > { %2046 = vst.msk [vmem:[#allocation3 + $0x70] sm:$0xff] %vm2031_vm8, %v2013_v54  ;;  %2062 = vst.msk [vmem:[#allocation3 + $0xf0] sm:$0xff] %vm2031_vm8, %v2029_v24  ;;  %v2106_v8 = vadd.f32 (!%p2380_p6), %v2105_v28, %v2104_v36  ;;  %v2131_v48 = vsel (!%p2380_p6), %vm2031_vm8, %v2084_v20, 0.0  ;;  %v2133_v30 = vsel (!%p2380_p6), %vm2031_vm8, %v2085_v14, 0.0  ;;  %v2135_v56 = vsel (!%p2380_p6), %vm2031_vm8, %v2086_v43, 0.0  ;;  %v2090_v53 = vld [vmem:[#allocation3 + $0xb0] sm:$0xff] (!%p2380_p6) }
 0x385   : > { %v2137_v51 = vsel %vm2031_vm8, %v2087_v31, 0.0  ;;  %v2139_v52 = vsel %vm2031_vm8, %v2088_v27, 0.0  ;;  %v2141_v24 = vsel %vm2031_vm8, %v2089_v9, 0.0  ;;  %v2091_v25 = vld [vmem:[#allocation3 + $0xb8] sm:$0xff]  ;;  %v2143_v58 = vsel %vm2031_vm8, %v2090_v53, 0.0  ;;  %v2092_v59 = vld [vmem:[#allocation3 + $0xc0] sm:$0xff] }
 0x386   : > { %v2108_v50 = vadd.f32 %v2107_v39, %v2106_v8  ;;  %v2081_v34 = vld [vmem:[#allocation3 + $0x68] sm:$0xff]  ;;  %v2145_v63 = vsel %vm2031_vm8, %v2091_v25, 0.0  ;;  %v2147_v4 = vsel %vm2031_vm8, %v2092_v59, 0.0  ;;  %v2094_v28 = vld [vmem:[#allocation3 + $0xd0] sm:$0xff]  ;;  %v2095_v39 = vld [vmem:[#allocation3 + $0xd8] sm:$0xff] }
 0x387   : > { %v2080_v32 = vld [vmem:[#allocation3 + $0x60] sm:$0xff]  ;;  %v2125_v41 = vsel %vm2031_vm8, %v2081_v34, 0.0  ;;  %v2093_v0 = vld [vmem:[#allocation3 + $0xc8] sm:$0xff]  ;;  %v2151_v8 = vsel %vm2031_vm8, %v2094_v28, 0.0 }
 0x388   : > { %v2110_v37 = vadd.f32 %v2109_v16, %v2108_v50  ;;  %v2123_v62 = vsel %vm2031_vm8, %v2080_v32, 0.0  ;;  %v2149_v36 = vsel %vm2031_vm8, %v2093_v0, 0.0  ;;  %v2096_v16 = vld [vmem:[#allocation3 + $0xe0] sm:$0xff]  ;;  %v2153_v50 = vsel %vm2031_vm8, %v2095_v39, 0.0 }
 0x38a   : > { %v2112_v12 = vadd.f32 %v2111_v1, %v2110_v37  ;;  %v2083_v5 = vld [vmem:[#allocation3 + $0x78] sm:$0xff]  ;;  %v2097_v1 = vld [vmem:[#allocation3 + $0xe8] sm:$0xff]  ;;  %v2155_v37 = vsel %vm2031_vm8, %v2096_v16, 0.0 }
 0x38b   : > { %v2082_v35 = vld [vmem:[#allocation3 + $0x70] sm:$0xff]  ;;  %v2129_v47 = vsel %vm2031_vm8, %v2083_v5, 0.0 }
 0x38c   : > { %v2114_v18 = vadd.f32 %v2113_v38, %v2112_v12  ;;  %v2127_v19 = vsel %vm2031_vm8, %v2082_v35, 0.0  ;;  %v2098_v38 = vld [vmem:[#allocation3 + $0xf0] sm:$0xff]  ;;  %v2157_v12 = vsel %vm2031_vm8, %v2097_v1, 0.0 }
 0x38e   : > { %v2116_v26 = vadd.f32 %v2115_v13, %v2114_v18  ;;  %v2099_v13 = vld [vmem:[#allocation3 + $0xf8] sm:$0xff]  ;;  %v2159_v18 = vsel %vm2031_vm8, %v2098_v38, 0.0 }
 0x38f   : > { %v2161_v23 = vsel %vm2031_vm8, %v2099_v13, 0.0 }
 0x390   : > { %v2118_v11 = vadd.f32 %v2117_v22, %v2116_v26 }
 0x392   : > { %v2120_v61 = vadd.f32 %v2119_v10, %v2118_v11 }
 0x394   : > { %v2122_v40 = vadd.f32 %v2121_v33, %v2120_v61 }
 0x396   : > { %v2124_v6 = vadd.f32 %v2123_v62, %v2122_v40 }
 0x398   : > { %v2126_v42 = vadd.f32 %v2125_v41, %v2124_v6 }
 0x39a   : > { %v2128_v21 = vadd.f32 %v2127_v19, %v2126_v42 }
 0x39c   : > { %v2130_v45 = vadd.f32 %v2129_v47, %v2128_v21 }
 0x39e   : > { %v2132_v46 = vadd.f32 %v2131_v48, %v2130_v45 }
 0x3a0   : > { %v2134_v57 = vadd.f32 %v2133_v30, %v2132_v46 }
 0x3a2   : > { %v2136_v15 = vadd.f32 %v2135_v56, %v2134_v57 }
 0x3a4   : > { %v2138_v54 = vadd.f32 %v2137_v51, %v2136_v15 }
 0x3a6   : > { %v2140_v55 = vadd.f32 %v2139_v52, %v2138_v54 }
 0x3a8   : > { %v2142_v60 = vadd.f32 %v2141_v24, %v2140_v55 }
 0x3aa   : > { %v2144_v3 = vadd.f32 %v2143_v58, %v2142_v60 }
 0x3ac   : > { %v2146_v29 = vadd.f32 %v2145_v63, %v2144_v3 }
 0x3ae   : > { %v2148_v7 = vadd.f32 %v2147_v4, %v2146_v29 }
 0x3b0   : > { %v2150_v49 = vadd.f32 %v2149_v36, %v2148_v7 }
 0x3b2   : > { %v2152_v2 = vadd.f32 %v2151_v8, %v2150_v49 }
 0x3b4   : > { %v2154_v44 = vadd.f32 %v2153_v50, %v2152_v2 }
 0x3b6   : > { %v2156_v17 = vadd.f32 %v2155_v37, %v2154_v44 }
 0x3b8   : > { %v2158_v22 = vadd.f32 %v2157_v12, %v2156_v17 }
 0x3ba   : > { %v2160_v26 = vadd.f32 %v2159_v18, %v2158_v22 }
 0x3bc   : > { %v2162_v10 = vadd.f32 %v2161_v23, %v2160_v26 }
 0x3be   : > { %v2163_v32 = vrot.slane %v2162_v10, 4 }
 0x3c0   : > { %v2164_v11 = vadd.f32 %v2163_v32, %v2162_v10 }
 0x3c2   : > { %v2165_v33 = vrot.slane %v2164_v11, 2 }
 0x3c4   : > { %v2166_v34 = vadd.f32 %v2165_v33, %v2164_v11 }
 0x3c6   : > { %v2167_v61 = vrot.slane %v2166_v34, 1 }
 0x3c8   : > { %v2168_v62 = vadd.f32 %v2167_v61, %v2166_v34 }
 0x3ca   : > { %2170 = vst.msk [vmem:[#allocation4] sm:$0x1] %vm2169_vm9, %v2168_v62 }
 0x3cb PF: > { %p3553_p7 = scmp.eq.s32.totalorder %s2269_s12, 1  ;;  %s2777_s21 = smov [#allocation4]  }
 0x3cc   : > { %s2180_s14 = sshll.u32 %s2777_s21, 4  ;;  %s2181_s14 = int_to_ptr.vmem [resolvable:$true] %s2180_s14 }
 0x3cd   : > { %s2720_s15 = scalar_lea.vmem %s2181_s14, 16  ;;  %s2726_s16 = scalar_lea.vmem %s2181_s14, 32 }
 0x3ce   : > { %p2721_p8 = scmp.ne.s32.totalorder %s2181_s14, %s2720_s15  ;;  %p2727_p11 = scmp.lt.s32.totalorder %s2181_s14, %s2181_s14 }
 0x3cf   : > { %p2728_p12 = scmp.lt.s32.totalorder %s2726_s16, %s2720_s15 }
 0x3d0   : > { %p2722_p9 = pnand %p2721_p8, %p3553_p7 }
 0x3d1   : > { %p2729_p13 = por %p2728_p12, %p2727_p11 }
 0x3d2   : > { %p2723_p10 = pneg %p2722_p9 }
 0x3d4   : > { %p2730_p0 = pnand %p2729_p13, %p2723_p10 }
 0x3d6   : > { %2733 = shalt.err (!%p2730_p0)
}
 0x3d7   : > { %s2734_s19 = scalar_lea.hbm %s3597_s9, 16 }
 0x3d8   : > { %p2735_p1 = scmp.ne.s32.totalorder %s3597_s9, %s2734_s19  ;;  %p2740_p4 = scmp.lt.u32.totalorder %s2734_s19, %s3597_s9 }
 0x3da   : > { %p2736_p2 = pnand %p2735_p1, %p3553_p7 }
 0x3dc   : > { %p2737_p3 = pneg %p2736_p2 }
 0x3de   : > { %p2742_p5 = pnand %p2740_p4, %p2737_p3 }
 0x3e0   : > { %2745 = shalt.err (!%p2742_p5)
}
 0x3e1   : > { %2687 = dma.vmem_to_hbm [thread:$0]  (%p3553_p7), %s2181_s14, 16, %s3597_s9, [#allocation5]  }
 0x3e2   : > { %2759 = dma.done.wait (%p3553_p7), [#allocation5], 16  }
 0x3e3   : > { %2761 = vsyncadd (%p3553_p7), [#allocation5], 4294967280 }
 0x3e4 PF: > { %s20_s11 = sadd.s32 1, %s2772_s11   ;;  %s3599_s30 = smov %s2768_s10 }
 0x3e5   : > { %p17_p6 = scmp.ge.s32.totalorder %s20_s11, 4   ;;  %s3600_s10 = smov %s3602_s13 }
 0x3e7   :  { %19 = sbr.rel (!%p17_p6) target bundleno = 2 (0x2), region = 100 }
 0x3ee   :  { %2193 = vsyncpa [#allocation5], 1 }
 0x3ef   :  { %2195 = vsyncpa [#allocation5 + $0x1], 1 }

</bundles_post_ra>
